<compile_context>
chip_gen: v7x
topology: tpu7x:2x2x1
jax: 0.10.0
libtpu: 0.0.40
codegen_flags: <defaults>
</compile_context>

<pallas_src>
import math
import numpy as np
import jax
import jax.numpy as jnp
from jax.experimental import pallas as pl
from jax.experimental.pallas import tpu as pltpu

# ----- small, module-consistent configuration -----
B = 2          # batch
S = 8          # sequence length (== d_model for the positional embedding)
F_IN = 6       # feature_num
F_PAD = 8      # padded feature dim fed to the kernel
OUT_PAD = 128  # lane-dense output width (kernel writes (N, 128), wrapper slices)
H = 32         # hidden
FF = 64        # hidden_ff
NH = 4         # n_heads
DH = H // NH   # head dim
NL = 2         # n_layers
EPS = 1e-12
NROWS = B * S


# ----------------- in-kernel math helpers -----------------
def _gelu(x):
    # tanh-approximate GELU: transcendental goes to the EUP slot.
    c = math.sqrt(2.0 / math.pi)
    return 0.5 * x * (1.0 + jnp.tanh(c * (x + 0.044715 * x * x * x)))


def _layernorm(x, g, b):
    mu = jnp.mean(x, axis=-1, keepdims=True)
    xc = x - mu
    var = jnp.mean(xc * xc, axis=-1, keepdims=True)
    return xc * jax.lax.rsqrt(var + EPS) * g + b


def _bf16(x):
    return x.astype(jnp.bfloat16)


# ----------------------- the kernel ------------------------
def limu_kernel(x_ref, pos_ref, seg_ref, segT_ref,
                w_in_ref, b_in_ref, g0_ref, be0_ref,
                wqkv_ref, bqkv_ref,
                wo_ref, bo_ref, wp_ref, bp_ref, g1_ref, be1_ref,
                w1_ref, b1_ref, w2_ref, b2_ref, g2_ref, be2_ref,
                wl_ref, bl_ref, gh_ref, beh_ref, wd_ref, bd_ref,
                out_ref):
    f32 = jnp.float32

    # ---- hoist: load every loop-reused weight / bias ONCE (the NL loop below
    #      is trace-unrolled, so per-iteration loads+broadcasts would be
    #      duplicated; JAX does not CSE broadcast_in_dim). Weights arrive
    #      pre-cast to bf16 from the wrapper. ----
    seg = seg_ref[...]          # (H, NH)  bf16 0/1: per-head segment-sum matrix
    segT = segT_ref[...]        # (NH, H)  bf16 0/1: head-weight expansion matrix
    w_qkv = wqkv_ref[...]       # (H, 3H)  bf16 fused Q|K|V projection
    b_qkv = jnp.broadcast_to(bqkv_ref[...], (NROWS, 3 * H))
    wo = wo_ref[...]
    bo = jnp.broadcast_to(bo_ref[...], (NROWS, H))
    wp = wp_ref[...]
    bp = jnp.broadcast_to(bp_ref[...], (NROWS, H))
    g1 = jnp.broadcast_to(g1_ref[...], (NROWS, H))
    be1 = jnp.broadcast_to(be1_ref[...], (NROWS, H))
    w1 = w1_ref[...]
    b1 = jnp.broadcast_to(b1_ref[...], (NROWS, FF))
    w2 = w2_ref[...]
    b2 = jnp.broadcast_to(b2_ref[...], (NROWS, H))
    g2 = jnp.broadcast_to(g2_ref[...], (NROWS, H))
    be2 = jnp.broadcast_to(be2_ref[...], (NROWS, H))

    # ---- encoder embedding: linear + pos_embed + layernorm ----
    x = _bf16(x_ref[...])                                      # (N, F_PAD)
    h = jnp.dot(x, w_in_ref[...], preferred_element_type=f32) + b_in_ref[...]
    h = h + pos_ref[...]
    h = _layernorm(h, g0_ref[...], be0_ref[...])

    scale = 1.0 / math.sqrt(DH)
    for _ in range(NL):                      # same weights reused every layer
        # ---- MultiheadAttention (attends over the batch axis, see note) ----
        # fused QKV: one (N,H)@(H,3H) MXU launch instead of three 32-lane ones
        qkv = jnp.dot(_bf16(h), w_qkv, preferred_element_type=f32) + b_qkv
        q3 = qkv[:, 0:H].reshape(B, S, H)
        k3 = qkv[:, H:2 * H].reshape(B, S, H)
        v3 = qkv[:, 2 * H:3 * H].reshape(B, S, H)

        # scores[b,c,s,n] = sum_d q[b,s,n*DH+d] * k[c,s,n*DH+d]
        # per-head segment sum done on the MXU via the 0/1 seg matrix.
        prod = q3[:, None, :, :] * k3[None, :, :, :]            # (B,B,S,H) f32
        prod2 = _bf16(prod.reshape(B * B * S, H))
        scores = jnp.dot(prod2, seg, preferred_element_type=f32) * scale
        scores = scores.reshape(B, B, S, NH)

        # softmax over the key axis c (the batch_first=False quirk)
        m = jnp.max(scores, axis=1, keepdims=True)
        e = jnp.exp(scores - m)
        denom = jnp.sum(e, axis=1, keepdims=True)
        wgt = e * pl.reciprocal(denom, approx=True)             # (B,B,S,NH)

        # expand head weights back to H lanes on the MXU, weighted-sum over c
        wgt2 = jnp.dot(_bf16(wgt.reshape(B * B * S, NH)), segT,
                       preferred_element_type=f32).reshape(B, B, S, H)
        attn = jnp.sum(wgt2 * v3[None, :, :, :], axis=1).reshape(NROWS, H)

        h = jnp.dot(_bf16(attn), wo, preferred_element_type=f32) + bo

        # ---- h = norm1(h + proj(h))  (residual is the attention OUTPUT) ----
        pr = jnp.dot(_bf16(h), wp, preferred_element_type=f32) + bp
        h = _layernorm(h + pr, g1, be1)

        # ---- h = norm2(h + pwff(h)) ----
        f = jnp.dot(_bf16(h), w1, preferred_element_type=f32) + b1
        f = _gelu(f)
        f = jnp.dot(_bf16(f), w2, preferred_element_type=f32) + b2
        h = _layernorm(h + f, g2, be2)

    # ---- decoding head: gelu(linear(h)) -> norm -> decoder (lane-dense) ----
    h = jnp.dot(_bf16(h), wl_ref[...], preferred_element_type=f32) + bl_ref[...]
    h = _gelu(h)
    h = _layernorm(h, gh_ref[...], beh_ref[...])
    # wd is zero-padded to 128 output lanes -> full unmasked (N,128) store
    out_ref[...] = jnp.dot(_bf16(h), wd_ref[...], preferred_element_type=f32) + bd_ref[...]


# ---------------------- wrapper (glue) ----------------------
def limu_forward(x, params):
    b, s, _ = x.shape
    n = b * s

    # lane/layout-friendly padding (zero-pad contributes 0 to the dot products)
    x2 = x.reshape(n, F_IN)
    x_pad = jnp.zeros((n, F_PAD), jnp.float32).at[:, :F_IN].set(x2)
    w_in_pad = jnp.zeros((F_PAD, H), jnp.float32).at[:F_IN, :].set(params["w_in"])
    wd_pad = jnp.zeros((H, OUT_PAD), jnp.float32).at[:, :F_IN].set(params["wd"])
    bd_pad = jnp.zeros((1, OUT_PAD), jnp.float32).at[:, :F_IN].set(params["bd"])

    pos = jnp.tile(params["pos_embed"][:s], (b, 1))             # (N, H), row = b*S + s

    # fused QKV weights + 0/1 segment matrices for per-head MXU reductions
    w_qkv = jnp.concatenate([params["wq"], params["wk"], params["wv"]], axis=1)
    b_qkv = jnp.concatenate([params["bq"], params["bk"], params["bv"]], axis=1)
    seg = jnp.repeat(jnp.eye(NH, dtype=jnp.bfloat16), DH, axis=0)   # (H, NH)
    segT = seg.T                                                     # (NH, H)

    bf = lambda a: a.astype(jnp.bfloat16)   # MXU-native weight dtype (f32 accum)
    args = [
        x_pad, pos, seg, segT,
        bf(w_in_pad), params["b_in"], params["g0"], params["be0"],
        bf(w_qkv), b_qkv,
        bf(params["wo"]), params["bo"], bf(params["wp"]), params["bp"],
        params["g1"], params["be1"],
        bf(params["w1"]), params["b1"], bf(params["w2"]), params["b2"],
        params["g2"], params["be2"],
        bf(params["wl"]), params["bl"], params["gh"], params["beh"],
        bf(wd_pad), bd_pad,
    ]
    vmem = pl.BlockSpec(memory_space=pltpu.MemorySpace.VMEM)
    out = pl.pallas_call(
        limu_kernel,
        out_shape=jax.ShapeDtypeStruct((n, OUT_PAD), jnp.float32),
        in_specs=[vmem] * len(args),
        out_specs=vmem,
    )(*args)
    return out[:, :F_IN].reshape(b, s, F_IN)


# ----------------- deterministic parameter init -----------------
def make_params(key):
    ks = jax.random.split(key, 16)

    def lin(k, fi, fo):
        k1, k2 = jax.random.split(k)
        bd = 1.0 / math.sqrt(fi)
        w = jax.random.uniform(k1, (fi, fo), jnp.float32, -bd, bd)
        bias = jax.random.uniform(k2, (1, fo), jnp.float32, -bd, bd)
        return w, bias

    p = {}
    p["w_in"], p["b_in"] = lin(ks[0], F_IN, H)
    p["pos_embed"] = 0.02 * jax.random.normal(ks[1], (S, H), jnp.float32)
    p["g0"], p["be0"] = jnp.ones((1, H), jnp.float32), jnp.zeros((1, H), jnp.float32)
    xav = math.sqrt(6.0 / (H + H))
    p["wq"] = jax.random.uniform(ks[2], (H, H), jnp.float32, -xav, xav)
    p["wk"] = jax.random.uniform(ks[3], (H, H), jnp.float32, -xav, xav)
    p["wv"] = jax.random.uniform(ks[4], (H, H), jnp.float32, -xav, xav)
    p["bq"] = jnp.zeros((1, H), jnp.float32)
    p["bk"] = jnp.zeros((1, H), jnp.float32)
    p["bv"] = jnp.zeros((1, H), jnp.float32)
    p["wo"], p["bo"] = lin(ks[5], H, H)
    p["wp"], p["bp"] = lin(ks[6], H, H)
    p["g1"], p["be1"] = jnp.ones((1, H), jnp.float32), jnp.zeros((1, H), jnp.float32)
    p["w1"], p["b1"] = lin(ks[7], H, FF)
    p["w2"], p["b2"] = lin(ks[8], FF, H)
    p["g2"], p["be2"] = jnp.ones((1, H), jnp.float32), jnp.zeros((1, H), jnp.float32)
    p["wl"], p["bl"] = lin(ks[9], H, H)
    p["gh"], p["beh"] = jnp.ones((1, H), jnp.float32), jnp.zeros((1, H), jnp.float32)
    p["wd"], p["bd"] = lin(ks[10], H, F_IN)
    return p


# ------------------- pure-JAX reference (f32, exact GELU) -------------------
def reference(x, params):
    b, s, _ = x.shape

    def ln(t, g, be):
        mu = jnp.mean(t, -1, keepdims=True)
        var = jnp.mean((t - mu) ** 2, -1, keepdims=True)
        return (t - mu) / jnp.sqrt(var + EPS) * g + be

    gelu = lambda t: jax.nn.gelu(t, approximate=False)      # exact erf GELU (PyTorch default)

    h = x @ params["w_in"] + params["b_in"]
    h = h + params["pos_embed"][:s][None]
    h = ln(h, params["g0"], params["be0"])
    for _ in range(NL):
        q = (h @ params["wq"] + params["bq"]).reshape(b, s, NH, DH)
        k = (h @ params["wk"] + params["bk"]).reshape(b, s, NH, DH)
        v = (h @ params["wv"] + params["bv"]).reshape(b, s, NH, DH)
        scores = jnp.einsum("bsnd,csnd->nsbc", q, k) / math.sqrt(DH)
        w = jax.nn.softmax(scores, axis=-1)
        o = jnp.einsum("nsbc,csnd->bsnd", w, v).reshape(b, s, H)
        h = o @ params["wo"] + params["bo"]
        h = ln(h + (h @ params["wp"] + params["bp"]), params["g1"], params["be1"])
        f = gelu(h @ params["w1"] + params["b1"]) @ params["w2"] + params["b2"]
        h = ln(h + f, params["g2"], params["be2"])
    h = gelu(h @ params["wl"] + params["bl"])
    h = ln(h, params["gh"], params["beh"])
    return h @ params["wd"] + params["bd"]


if __name__ == "__main__":
    key = jax.random.PRNGKey(0)
    kx, kp = jax.random.split(key)
    x = jax.random.normal(kx, (B, S, F_IN), jnp.float32)
    params = make_params(kp)

    out = limu_forward(x, params)
    out = jax.block_until_ready(out)

    ref = reference(x, params)
    np.testing.assert_allclose(np.asarray(out), np.asarray(ref), rtol=5e-2, atol=5e-2)
    print("KERNEL_OK")
</pallas_src>

<mosaic_0001>
module attributes {stable_mosaic.version = 11 : i64} {
  func.func @limu_kernel(%arg0: memref<16x8xf32, #tpu.memory_space<vmem>>, %arg1: memref<16x32xf32, #tpu.memory_space<vmem>>, %arg2: memref<32x4xbf16, #tpu.memory_space<vmem>>, %arg3: memref<4x32xbf16, #tpu.memory_space<vmem>>, %arg4: memref<8x32xbf16, #tpu.memory_space<vmem>>, %arg5: memref<1x32xf32, #tpu.memory_space<vmem>>, %arg6: memref<1x32xf32, #tpu.memory_space<vmem>>, %arg7: memref<1x32xf32, #tpu.memory_space<vmem>>, %arg8: memref<32x96xbf16, #tpu.memory_space<vmem>>, %arg9: memref<1x96xf32, #tpu.memory_space<vmem>>, %arg10: memref<32x32xbf16, #tpu.memory_space<vmem>>, %arg11: memref<1x32xf32, #tpu.memory_space<vmem>>, %arg12: memref<32x32xbf16, #tpu.memory_space<vmem>>, %arg13: memref<1x32xf32, #tpu.memory_space<vmem>>, %arg14: memref<1x32xf32, #tpu.memory_space<vmem>>, %arg15: memref<1x32xf32, #tpu.memory_space<vmem>>, %arg16: memref<32x64xbf16, #tpu.memory_space<vmem>>, %arg17: memref<1x64xf32, #tpu.memory_space<vmem>>, %arg18: memref<64x32xbf16, #tpu.memory_space<vmem>>, %arg19: memref<1x32xf32, #tpu.memory_space<vmem>>, %arg20: memref<1x32xf32, #tpu.memory_space<vmem>>, %arg21: memref<1x32xf32, #tpu.memory_space<vmem>>, %arg22: memref<32x32xbf16, #tpu.memory_space<vmem>>, %arg23: memref<1x32xf32, #tpu.memory_space<vmem>>, %arg24: memref<1x32xf32, #tpu.memory_space<vmem>>, %arg25: memref<1x32xf32, #tpu.memory_space<vmem>>, %arg26: memref<32x128xbf16, #tpu.memory_space<vmem>>, %arg27: memref<1x128xf32, #tpu.memory_space<vmem>>, %arg28: memref<16x128xf32, #tpu.memory_space<vmem>>) attributes {dimension_semantics = [], scalar_prefetch = 0 : i64, scratch_operands = 0 : i64, tpu.core_type = #tpu.core_type<tc>} {
    %c0 = arith.constant 0 : index
    %c0_0 = arith.constant 0 : index
    %0 = vector.load %arg2[%c0, %c0_0] : memref<32x4xbf16, #tpu.memory_space<vmem>>, vector<32x4xbf16>
    %c0_1 = arith.constant 0 : index
    %c0_2 = arith.constant 0 : index
    %1 = vector.load %arg3[%c0_1, %c0_2] : memref<4x32xbf16, #tpu.memory_space<vmem>>, vector<4x32xbf16>
    %c0_3 = arith.constant 0 : index
    %c0_4 = arith.constant 0 : index
    %2 = vector.load %arg8[%c0_3, %c0_4] : memref<32x96xbf16, #tpu.memory_space<vmem>>, vector<32x96xbf16>
    %c0_5 = arith.constant 0 : index
    %c0_6 = arith.constant 0 : index
    %3 = vector.load %arg9[%c0_5, %c0_6] : memref<1x96xf32, #tpu.memory_space<vmem>>, vector<1x96xf32>
    %4 = vector.shape_cast %3 : vector<1x96xf32> to vector<1x96xf32>
    %5 = vector.broadcast %4 : vector<1x96xf32> to vector<16x96xf32>
    %c0_7 = arith.constant 0 : index
    %c0_8 = arith.constant 0 : index
    %6 = vector.load %arg10[%c0_7, %c0_8] : memref<32x32xbf16, #tpu.memory_space<vmem>>, vector<32x32xbf16>
    %c0_9 = arith.constant 0 : index
    %c0_10 = arith.constant 0 : index
    %7 = vector.load %arg11[%c0_9, %c0_10] : memref<1x32xf32, #tpu.memory_space<vmem>>, vector<1x32xf32>
    %8 = vector.shape_cast %7 : vector<1x32xf32> to vector<1x32xf32>
    %9 = vector.broadcast %8 : vector<1x32xf32> to vector<16x32xf32>
    %c0_11 = arith.constant 0 : index
    %c0_12 = arith.constant 0 : index
    %10 = vector.load %arg12[%c0_11, %c0_12] : memref<32x32xbf16, #tpu.memory_space<vmem>>, vector<32x32xbf16>
    %c0_13 = arith.constant 0 : index
    %c0_14 = arith.constant 0 : index
    %11 = vector.load %arg13[%c0_13, %c0_14] : memref<1x32xf32, #tpu.memory_space<vmem>>, vector<1x32xf32>
    %12 = vector.shape_cast %11 : vector<1x32xf32> to vector<1x32xf32>
    %13 = vector.broadcast %12 : vector<1x32xf32> to vector<16x32xf32>
    %c0_15 = arith.constant 0 : index
    %c0_16 = arith.constant 0 : index
    %14 = vector.load %arg14[%c0_15, %c0_16] : memref<1x32xf32, #tpu.memory_space<vmem>>, vector<1x32xf32>
    %15 = vector.shape_cast %14 : vector<1x32xf32> to vector<1x32xf32>
    %16 = vector.broadcast %15 : vector<1x32xf32> to vector<16x32xf32>
    %c0_17 = arith.constant 0 : index
    %c0_18 = arith.constant 0 : index
    %17 = vector.load %arg15[%c0_17, %c0_18] : memref<1x32xf32, #tpu.memory_space<vmem>>, vector<1x32xf32>
    %18 = vector.shape_cast %17 : vector<1x32xf32> to vector<1x32xf32>
    %19 = vector.broadcast %18 : vector<1x32xf32> to vector<16x32xf32>
    %c0_19 = arith.constant 0 : index
    %c0_20 = arith.constant 0 : index
    %20 = vector.load %arg16[%c0_19, %c0_20] : memref<32x64xbf16, #tpu.memory_space<vmem>>, vector<32x64xbf16>
    %c0_21 = arith.constant 0 : index
    %c0_22 = arith.constant 0 : index
    %21 = vector.load %arg17[%c0_21, %c0_22] : memref<1x64xf32, #tpu.memory_space<vmem>>, vector<1x64xf32>
    %22 = vector.shape_cast %21 : vector<1x64xf32> to vector<1x64xf32>
    %23 = vector.broadcast %22 : vector<1x64xf32> to vector<16x64xf32>
    %c0_23 = arith.constant 0 : index
    %c0_24 = arith.constant 0 : index
    %24 = vector.load %arg18[%c0_23, %c0_24] : memref<64x32xbf16, #tpu.memory_space<vmem>>, vector<64x32xbf16>
    %c0_25 = arith.constant 0 : index
    %c0_26 = arith.constant 0 : index
    %25 = vector.load %arg19[%c0_25, %c0_26] : memref<1x32xf32, #tpu.memory_space<vmem>>, vector<1x32xf32>
    %26 = vector.shape_cast %25 : vector<1x32xf32> to vector<1x32xf32>
    %27 = vector.broadcast %26 : vector<1x32xf32> to vector<16x32xf32>
    %c0_27 = arith.constant 0 : index
    %c0_28 = arith.constant 0 : index
    %28 = vector.load %arg20[%c0_27, %c0_28] : memref<1x32xf32, #tpu.memory_space<vmem>>, vector<1x32xf32>
    %29 = vector.shape_cast %28 : vector<1x32xf32> to vector<1x32xf32>
    %30 = vector.broadcast %29 : vector<1x32xf32> to vector<16x32xf32>
    %c0_29 = arith.constant 0 : index
    %c0_30 = arith.constant 0 : index
    %31 = vector.load %arg21[%c0_29, %c0_30] : memref<1x32xf32, #tpu.memory_space<vmem>>, vector<1x32xf32>
    %32 = vector.shape_cast %31 : vector<1x32xf32> to vector<1x32xf32>
    %33 = vector.broadcast %32 : vector<1x32xf32> to vector<16x32xf32>
    %c0_31 = arith.constant 0 : index
    %c0_32 = arith.constant 0 : index
    %34 = vector.load %arg0[%c0_31, %c0_32] : memref<16x8xf32, #tpu.memory_space<vmem>>, vector<16x8xf32>
    %35 = arith.truncf %34 : vector<16x8xf32> to vector<16x8xbf16>
    %c0_33 = arith.constant 0 : index
    %c0_34 = arith.constant 0 : index
    %36 = vector.load %arg4[%c0_33, %c0_34] : memref<8x32xbf16, #tpu.memory_space<vmem>>, vector<8x32xbf16>
    %cst = arith.constant dense<0.000000e+00> : vector<16x32xf32>
    %37 = tpu.matmul %35, %36, %cst {dimension_numbers = #tpu.dot_dimension_numbers<[1], [0], [0], [1], [0, 0, 1, 1], [], []>} : vector<16x8xbf16>, vector<8x32xbf16>, vector<16x32xf32> -> vector<16x32xf32>
    %c0_35 = arith.constant 0 : index
    %c0_36 = arith.constant 0 : index
    %38 = vector.load %arg5[%c0_35, %c0_36] : memref<1x32xf32, #tpu.memory_space<vmem>>, vector<1x32xf32>
    %39 = vector.broadcast %38 : vector<1x32xf32> to vector<16x32xf32>
    %40 = arith.addf %37, %39 : vector<16x32xf32>
    %c0_37 = arith.constant 0 : index
    %c0_38 = arith.constant 0 : index
    %41 = vector.load %arg1[%c0_37, %c0_38] : memref<16x32xf32, #tpu.memory_space<vmem>>, vector<16x32xf32>
    %42 = arith.addf %40, %41 : vector<16x32xf32>
    %c0_39 = arith.constant 0 : index
    %c0_40 = arith.constant 0 : index
    %43 = vector.load %arg6[%c0_39, %c0_40] : memref<1x32xf32, #tpu.memory_space<vmem>>, vector<1x32xf32>
    %c0_41 = arith.constant 0 : index
    %c0_42 = arith.constant 0 : index
    %44 = vector.load %arg7[%c0_41, %c0_42] : memref<1x32xf32, #tpu.memory_space<vmem>>, vector<1x32xf32>
    %cst_43 = arith.constant dense<0.000000e+00> : vector<16xf32>
    %45 = vector.multi_reduction <add>, %42, %cst_43 [1] : vector<16x32xf32> to vector<16xf32>
    %46 = vector.shape_cast %45 : vector<16xf32> to vector<16x1xf32>
    %cst_44 = arith.constant 3.200000e+01 : f32
    %47 = vector.broadcast %cst_44 : f32 to vector<16x1xf32>
    %48 = arith.divf %46, %47 : vector<16x1xf32>
    %49 = vector.broadcast %48 : vector<16x1xf32> to vector<16x32xf32>
    %50 = arith.subf %42, %49 : vector<16x32xf32>
    %51 = arith.mulf %50, %50 : vector<16x32xf32>
    %cst_45 = arith.constant dense<0.000000e+00> : vector<16xf32>
    %52 = vector.multi_reduction <add>, %51, %cst_45 [1] : vector<16x32xf32> to vector<16xf32>
    %53 = vector.shape_cast %52 : vector<16xf32> to vector<16x1xf32>
    %cst_46 = arith.constant 3.200000e+01 : f32
    %54 = vector.broadcast %cst_46 : f32 to vector<16x1xf32>
    %55 = arith.divf %53, %54 : vector<16x1xf32>
    %cst_47 = arith.constant 9.99999996E-13 : f32
    %56 = vector.broadcast %cst_47 : f32 to vector<16x1xf32>
    %57 = arith.addf %55, %56 : vector<16x1xf32>
    %58 = math.rsqrt %57 : vector<16x1xf32>
    %59 = vector.broadcast %58 : vector<16x1xf32> to vector<16x32xf32>
    %60 = arith.mulf %50, %59 : vector<16x32xf32>
    %61 = vector.broadcast %43 : vector<1x32xf32> to vector<16x32xf32>
    %62 = arith.mulf %60, %61 : vector<16x32xf32>
    %63 = vector.broadcast %44 : vector<1x32xf32> to vector<16x32xf32>
    %64 = arith.addf %62, %63 : vector<16x32xf32>
    %65 = arith.truncf %64 : vector<16x32xf32> to vector<16x32xbf16>
    %cst_48 = arith.constant dense<0.000000e+00> : vector<16x96xf32>
    %66 = tpu.matmul %65, %2, %cst_48 {dimension_numbers = #tpu.dot_dimension_numbers<[1], [0], [0], [1], [0, 0, 1, 1], [], []>} : vector<16x32xbf16>, vector<32x96xbf16>, vector<16x96xf32> -> vector<16x96xf32>
    %67 = arith.addf %66, %5 : vector<16x96xf32>
    %68 = vector.extract_strided_slice %67 {offsets = [0, 0], sizes = [16, 32], strides = [1, 1]} : vector<16x96xf32> to vector<16x32xf32>
    %69 = vector.shape_cast %68 : vector<16x32xf32> to vector<2x8x32xf32>
    %70 = vector.extract_strided_slice %67 {offsets = [0, 32], sizes = [16, 32], strides = [1, 1]} : vector<16x96xf32> to vector<16x32xf32>
    %71 = vector.shape_cast %70 : vector<16x32xf32> to vector<2x8x32xf32>
    %72 = vector.extract_strided_slice %67 {offsets = [0, 64], sizes = [16, 32], strides = [1, 1]} : vector<16x96xf32> to vector<16x32xf32>
    %73 = vector.shape_cast %72 : vector<16x32xf32> to vector<2x8x32xf32>
    %74 = vector.shape_cast %69 : vector<2x8x32xf32> to vector<2x1x8x32xf32>
    %75 = vector.shape_cast %71 : vector<2x8x32xf32> to vector<1x2x8x32xf32>
    %76 = vector.broadcast %74 : vector<2x1x8x32xf32> to vector<2x2x8x32xf32>
    %77 = vector.broadcast %75 : vector<1x2x8x32xf32> to vector<2x2x8x32xf32>
    %78 = arith.mulf %76, %77 : vector<2x2x8x32xf32>
    %79 = vector.shape_cast %78 : vector<2x2x8x32xf32> to vector<32x32xf32>
    %80 = arith.truncf %79 : vector<32x32xf32> to vector<32x32xbf16>
    %cst_49 = arith.constant dense<0.000000e+00> : vector<32x4xf32>
    %81 = tpu.matmul %80, %0, %cst_49 {dimension_numbers = #tpu.dot_dimension_numbers<[1], [0], [0], [1], [0, 0, 1, 1], [], []>} : vector<32x32xbf16>, vector<32x4xbf16>, vector<32x4xf32> -> vector<32x4xf32>
    %cst_50 = arith.constant 0.353553385 : f32
    %82 = vector.broadcast %cst_50 : f32 to vector<32x4xf32>
    %83 = arith.mulf %81, %82 : vector<32x4xf32>
    %84 = vector.shape_cast %83 : vector<32x4xf32> to vector<2x2x8x4xf32>
    %cst_51 = arith.constant dense<0xFF800000> : vector<2x8x4xf32>
    %85 = vector.multi_reduction <maximumf>, %84, %cst_51 [1] : vector<2x2x8x4xf32> to vector<2x8x4xf32>
    %86 = vector.shape_cast %85 : vector<2x8x4xf32> to vector<2x1x8x4xf32>
    %87 = vector.broadcast %86 : vector<2x1x8x4xf32> to vector<2x2x8x4xf32>
    %88 = arith.subf %84, %87 : vector<2x2x8x4xf32>
    %89 = math.exp %88 : vector<2x2x8x4xf32>
    %cst_52 = arith.constant dense<0.000000e+00> : vector<2x8x4xf32>
    %90 = vector.multi_reduction <add>, %89, %cst_52 [1] : vector<2x2x8x4xf32> to vector<2x8x4xf32>
    %91 = vector.shape_cast %90 : vector<2x8x4xf32> to vector<2x1x8x4xf32>
    %92 = tpu.reciprocal %91 {approx = true} : vector<2x1x8x4xf32> -> vector<2x1x8x4xf32>
    %93 = vector.broadcast %92 : vector<2x1x8x4xf32> to vector<2x2x8x4xf32>
    %94 = arith.mulf %89, %93 : vector<2x2x8x4xf32>
    %95 = vector.shape_cast %94 : vector<2x2x8x4xf32> to vector<32x4xf32>
    %96 = arith.truncf %95 : vector<32x4xf32> to vector<32x4xbf16>
    %cst_53 = arith.constant dense<0.000000e+00> : vector<32x32xf32>
    %97 = tpu.matmul %96, %1, %cst_53 {dimension_numbers = #tpu.dot_dimension_numbers<[1], [0], [0], [1], [0, 0, 1, 1], [], []>} : vector<32x4xbf16>, vector<4x32xbf16>, vector<32x32xf32> -> vector<32x32xf32>
    %98 = vector.shape_cast %97 : vector<32x32xf32> to vector<2x2x8x32xf32>
    %99 = vector.shape_cast %73 : vector<2x8x32xf32> to vector<1x2x8x32xf32>
    %100 = vector.broadcast %99 : vector<1x2x8x32xf32> to vector<2x2x8x32xf32>
    %101 = arith.mulf %98, %100 : vector<2x2x8x32xf32>
    %cst_54 = arith.constant dense<0.000000e+00> : vector<2x8x32xf32>
    %102 = vector.multi_reduction <add>, %101, %cst_54 [1] : vector<2x2x8x32xf32> to vector<2x8x32xf32>
    %103 = vector.shape_cast %102 : vector<2x8x32xf32> to vector<16x32xf32>
    %104 = arith.truncf %103 : vector<16x32xf32> to vector<16x32xbf16>
    %cst_55 = arith.constant dense<0.000000e+00> : vector<16x32xf32>
    %105 = tpu.matmul %104, %6, %cst_55 {dimension_numbers = #tpu.dot_dimension_numbers<[1], [0], [0], [1], [0, 0, 1, 1], [], []>} : vector<16x32xbf16>, vector<32x32xbf16>, vector<16x32xf32> -> vector<16x32xf32>
    %106 = arith.addf %105, %9 : vector<16x32xf32>
    %107 = arith.truncf %106 : vector<16x32xf32> to vector<16x32xbf16>
    %cst_56 = arith.constant dense<0.000000e+00> : vector<16x32xf32>
    %108 = tpu.matmul %107, %10, %cst_56 {dimension_numbers = #tpu.dot_dimension_numbers<[1], [0], [0], [1], [0, 0, 1, 1], [], []>} : vector<16x32xbf16>, vector<32x32xbf16>, vector<16x32xf32> -> vector<16x32xf32>
    %109 = arith.addf %108, %13 : vector<16x32xf32>
    %110 = arith.addf %106, %109 : vector<16x32xf32>
    %cst_57 = arith.constant dense<0.000000e+00> : vector<16xf32>
    %111 = vector.multi_reduction <add>, %110, %cst_57 [1] : vector<16x32xf32> to vector<16xf32>
    %112 = vector.shape_cast %111 : vector<16xf32> to vector<16x1xf32>
    %cst_58 = arith.constant 3.200000e+01 : f32
    %113 = vector.broadcast %cst_58 : f32 to vector<16x1xf32>
    %114 = arith.divf %112, %113 : vector<16x1xf32>
    %115 = vector.broadcast %114 : vector<16x1xf32> to vector<16x32xf32>
    %116 = arith.subf %110, %115 : vector<16x32xf32>
    %117 = arith.mulf %116, %116 : vector<16x32xf32>
    %cst_59 = arith.constant dense<0.000000e+00> : vector<16xf32>
    %118 = vector.multi_reduction <add>, %117, %cst_59 [1] : vector<16x32xf32> to vector<16xf32>
    %119 = vector.shape_cast %118 : vector<16xf32> to vector<16x1xf32>
    %cst_60 = arith.constant 3.200000e+01 : f32
    %120 = vector.broadcast %cst_60 : f32 to vector<16x1xf32>
    %121 = arith.divf %119, %120 : vector<16x1xf32>
    %cst_61 = arith.constant 9.99999996E-13 : f32
    %122 = vector.broadcast %cst_61 : f32 to vector<16x1xf32>
    %123 = arith.addf %121, %122 : vector<16x1xf32>
    %124 = math.rsqrt %123 : vector<16x1xf32>
    %125 = vector.broadcast %124 : vector<16x1xf32> to vector<16x32xf32>
    %126 = arith.mulf %116, %125 : vector<16x32xf32>
    %127 = arith.mulf %126, %16 : vector<16x32xf32>
    %128 = arith.addf %127, %19 : vector<16x32xf32>
    %129 = arith.truncf %128 : vector<16x32xf32> to vector<16x32xbf16>
    %cst_62 = arith.constant dense<0.000000e+00> : vector<16x64xf32>
    %130 = tpu.matmul %129, %20, %cst_62 {dimension_numbers = #tpu.dot_dimension_numbers<[1], [0], [0], [1], [0, 0, 1, 1], [], []>} : vector<16x32xbf16>, vector<32x64xbf16>, vector<16x64xf32> -> vector<16x64xf32>
    %131 = arith.addf %130, %23 : vector<16x64xf32>
    %cst_63 = arith.constant 5.000000e-01 : f32
    %132 = vector.broadcast %cst_63 : f32 to vector<16x64xf32>
    %133 = arith.mulf %132, %131 : vector<16x64xf32>
    %cst_64 = arith.constant 4.471500e-02 : f32
    %134 = vector.broadcast %cst_64 : f32 to vector<16x64xf32>
    %135 = arith.mulf %134, %131 : vector<16x64xf32>
    %136 = arith.mulf %135, %131 : vector<16x64xf32>
    %137 = arith.mulf %136, %131 : vector<16x64xf32>
    %138 = arith.addf %131, %137 : vector<16x64xf32>
    %cst_65 = arith.constant 0.797884583 : f32
    %139 = vector.broadcast %cst_65 : f32 to vector<16x64xf32>
    %140 = arith.mulf %139, %138 : vector<16x64xf32>
    %141 = math.tanh %140 : vector<16x64xf32>
    %cst_66 = arith.constant 1.000000e+00 : f32
    %142 = vector.broadcast %cst_66 : f32 to vector<16x64xf32>
    %143 = arith.addf %142, %141 : vector<16x64xf32>
    %144 = arith.mulf %133, %143 : vector<16x64xf32>
    %145 = arith.truncf %144 : vector<16x64xf32> to vector<16x64xbf16>
    %cst_67 = arith.constant dense<0.000000e+00> : vector<16x32xf32>
    %146 = tpu.matmul %145, %24, %cst_67 {dimension_numbers = #tpu.dot_dimension_numbers<[1], [0], [0], [1], [0, 0, 1, 1], [], []>} : vector<16x64xbf16>, vector<64x32xbf16>, vector<16x32xf32> -> vector<16x32xf32>
    %147 = arith.addf %146, %27 : vector<16x32xf32>
    %148 = arith.addf %128, %147 : vector<16x32xf32>
    %cst_68 = arith.constant dense<0.000000e+00> : vector<16xf32>
    %149 = vector.multi_reduction <add>, %148, %cst_68 [1] : vector<16x32xf32> to vector<16xf32>
    %150 = vector.shape_cast %149 : vector<16xf32> to vector<16x1xf32>
    %cst_69 = arith.constant 3.200000e+01 : f32
    %151 = vector.broadcast %cst_69 : f32 to vector<16x1xf32>
    %152 = arith.divf %150, %151 : vector<16x1xf32>
    %153 = vector.broadcast %152 : vector<16x1xf32> to vector<16x32xf32>
    %154 = arith.subf %148, %153 : vector<16x32xf32>
    %155 = arith.mulf %154, %154 : vector<16x32xf32>
    %cst_70 = arith.constant dense<0.000000e+00> : vector<16xf32>
    %156 = vector.multi_reduction <add>, %155, %cst_70 [1] : vector<16x32xf32> to vector<16xf32>
    %157 = vector.shape_cast %156 : vector<16xf32> to vector<16x1xf32>
    %cst_71 = arith.constant 3.200000e+01 : f32
    %158 = vector.broadcast %cst_71 : f32 to vector<16x1xf32>
    %159 = arith.divf %157, %158 : vector<16x1xf32>
    %cst_72 = arith.constant 9.99999996E-13 : f32
    %160 = vector.broadcast %cst_72 : f32 to vector<16x1xf32>
    %161 = arith.addf %159, %160 : vector<16x1xf32>
    %162 = math.rsqrt %161 : vector<16x1xf32>
    %163 = vector.broadcast %162 : vector<16x1xf32> to vector<16x32xf32>
    %164 = arith.mulf %154, %163 : vector<16x32xf32>
    %165 = arith.mulf %164, %30 : vector<16x32xf32>
    %166 = arith.addf %165, %33 : vector<16x32xf32>
    %167 = arith.truncf %166 : vector<16x32xf32> to vector<16x32xbf16>
    %cst_73 = arith.constant dense<0.000000e+00> : vector<16x96xf32>
    %168 = tpu.matmul %167, %2, %cst_73 {dimension_numbers = #tpu.dot_dimension_numbers<[1], [0], [0], [1], [0, 0, 1, 1], [], []>} : vector<16x32xbf16>, vector<32x96xbf16>, vector<16x96xf32> -> vector<16x96xf32>
    %169 = arith.addf %168, %5 : vector<16x96xf32>
    %170 = vector.extract_strided_slice %169 {offsets = [0, 0], sizes = [16, 32], strides = [1, 1]} : vector<16x96xf32> to vector<16x32xf32>
    %171 = vector.shape_cast %170 : vector<16x32xf32> to vector<2x8x32xf32>
    %172 = vector.extract_strided_slice %169 {offsets = [0, 32], sizes = [16, 32], strides = [1, 1]} : vector<16x96xf32> to vector<16x32xf32>
    %173 = vector.shape_cast %172 : vector<16x32xf32> to vector<2x8x32xf32>
    %174 = vector.extract_strided_slice %169 {offsets = [0, 64], sizes = [16, 32], strides = [1, 1]} : vector<16x96xf32> to vector<16x32xf32>
    %175 = vector.shape_cast %174 : vector<16x32xf32> to vector<2x8x32xf32>
    %176 = vector.shape_cast %171 : vector<2x8x32xf32> to vector<2x1x8x32xf32>
    %177 = vector.shape_cast %173 : vector<2x8x32xf32> to vector<1x2x8x32xf32>
    %178 = vector.broadcast %176 : vector<2x1x8x32xf32> to vector<2x2x8x32xf32>
    %179 = vector.broadcast %177 : vector<1x2x8x32xf32> to vector<2x2x8x32xf32>
    %180 = arith.mulf %178, %179 : vector<2x2x8x32xf32>
    %181 = vector.shape_cast %180 : vector<2x2x8x32xf32> to vector<32x32xf32>
    %182 = arith.truncf %181 : vector<32x32xf32> to vector<32x32xbf16>
    %cst_74 = arith.constant dense<0.000000e+00> : vector<32x4xf32>
    %183 = tpu.matmul %182, %0, %cst_74 {dimension_numbers = #tpu.dot_dimension_numbers<[1], [0], [0], [1], [0, 0, 1, 1], [], []>} : vector<32x32xbf16>, vector<32x4xbf16>, vector<32x4xf32> -> vector<32x4xf32>
    %cst_75 = arith.constant 0.353553385 : f32
    %184 = vector.broadcast %cst_75 : f32 to vector<32x4xf32>
    %185 = arith.mulf %183, %184 : vector<32x4xf32>
    %186 = vector.shape_cast %185 : vector<32x4xf32> to vector<2x2x8x4xf32>
    %cst_76 = arith.constant dense<0xFF800000> : vector<2x8x4xf32>
    %187 = vector.multi_reduction <maximumf>, %186, %cst_76 [1] : vector<2x2x8x4xf32> to vector<2x8x4xf32>
    %188 = vector.shape_cast %187 : vector<2x8x4xf32> to vector<2x1x8x4xf32>
    %189 = vector.broadcast %188 : vector<2x1x8x4xf32> to vector<2x2x8x4xf32>
    %190 = arith.subf %186, %189 : vector<2x2x8x4xf32>
    %191 = math.exp %190 : vector<2x2x8x4xf32>
    %cst_77 = arith.constant dense<0.000000e+00> : vector<2x8x4xf32>
    %192 = vector.multi_reduction <add>, %191, %cst_77 [1] : vector<2x2x8x4xf32> to vector<2x8x4xf32>
    %193 = vector.shape_cast %192 : vector<2x8x4xf32> to vector<2x1x8x4xf32>
    %194 = tpu.reciprocal %193 {approx = true} : vector<2x1x8x4xf32> -> vector<2x1x8x4xf32>
    %195 = vector.broadcast %194 : vector<2x1x8x4xf32> to vector<2x2x8x4xf32>
    %196 = arith.mulf %191, %195 : vector<2x2x8x4xf32>
    %197 = vector.shape_cast %196 : vector<2x2x8x4xf32> to vector<32x4xf32>
    %198 = arith.truncf %197 : vector<32x4xf32> to vector<32x4xbf16>
    %cst_78 = arith.constant dense<0.000000e+00> : vector<32x32xf32>
    %199 = tpu.matmul %198, %1, %cst_78 {dimension_numbers = #tpu.dot_dimension_numbers<[1], [0], [0], [1], [0, 0, 1, 1], [], []>} : vector<32x4xbf16>, vector<4x32xbf16>, vector<32x32xf32> -> vector<32x32xf32>
    %200 = vector.shape_cast %199 : vector<32x32xf32> to vector<2x2x8x32xf32>
    %201 = vector.shape_cast %175 : vector<2x8x32xf32> to vector<1x2x8x32xf32>
    %202 = vector.broadcast %201 : vector<1x2x8x32xf32> to vector<2x2x8x32xf32>
    %203 = arith.mulf %200, %202 : vector<2x2x8x32xf32>
    %cst_79 = arith.constant dense<0.000000e+00> : vector<2x8x32xf32>
    %204 = vector.multi_reduction <add>, %203, %cst_79 [1] : vector<2x2x8x32xf32> to vector<2x8x32xf32>
    %205 = vector.shape_cast %204 : vector<2x8x32xf32> to vector<16x32xf32>
    %206 = arith.truncf %205 : vector<16x32xf32> to vector<16x32xbf16>
    %cst_80 = arith.constant dense<0.000000e+00> : vector<16x32xf32>
    %207 = tpu.matmul %206, %6, %cst_80 {dimension_numbers = #tpu.dot_dimension_numbers<[1], [0], [0], [1], [0, 0, 1, 1], [], []>} : vector<16x32xbf16>, vector<32x32xbf16>, vector<16x32xf32> -> vector<16x32xf32>
    %208 = arith.addf %207, %9 : vector<16x32xf32>
    %209 = arith.truncf %208 : vector<16x32xf32> to vector<16x32xbf16>
    %cst_81 = arith.constant dense<0.000000e+00> : vector<16x32xf32>
    %210 = tpu.matmul %209, %10, %cst_81 {dimension_numbers = #tpu.dot_dimension_numbers<[1], [0], [0], [1], [0, 0, 1, 1], [], []>} : vector<16x32xbf16>, vector<32x32xbf16>, vector<16x32xf32> -> vector<16x32xf32>
    %211 = arith.addf %210, %13 : vector<16x32xf32>
    %212 = arith.addf %208, %211 : vector<16x32xf32>
    %cst_82 = arith.constant dense<0.000000e+00> : vector<16xf32>
    %213 = vector.multi_reduction <add>, %212, %cst_82 [1] : vector<16x32xf32> to vector<16xf32>
    %214 = vector.shape_cast %213 : vector<16xf32> to vector<16x1xf32>
    %cst_83 = arith.constant 3.200000e+01 : f32
    %215 = vector.broadcast %cst_83 : f32 to vector<16x1xf32>
    %216 = arith.divf %214, %215 : vector<16x1xf32>
    %217 = vector.broadcast %216 : vector<16x1xf32> to vector<16x32xf32>
    %218 = arith.subf %212, %217 : vector<16x32xf32>
    %219 = arith.mulf %218, %218 : vector<16x32xf32>
    %cst_84 = arith.constant dense<0.000000e+00> : vector<16xf32>
    %220 = vector.multi_reduction <add>, %219, %cst_84 [1] : vector<16x32xf32> to vector<16xf32>
    %221 = vector.shape_cast %220 : vector<16xf32> to vector<16x1xf32>
    %cst_85 = arith.constant 3.200000e+01 : f32
    %222 = vector.broadcast %cst_85 : f32 to vector<16x1xf32>
    %223 = arith.divf %221, %222 : vector<16x1xf32>
    %cst_86 = arith.constant 9.99999996E-13 : f32
    %224 = vector.broadcast %cst_86 : f32 to vector<16x1xf32>
    %225 = arith.addf %223, %224 : vector<16x1xf32>
    %226 = math.rsqrt %225 : vector<16x1xf32>
    %227 = vector.broadcast %226 : vector<16x1xf32> to vector<16x32xf32>
    %228 = arith.mulf %218, %227 : vector<16x32xf32>
    %229 = arith.mulf %228, %16 : vector<16x32xf32>
    %230 = arith.addf %229, %19 : vector<16x32xf32>
    %231 = arith.truncf %230 : vector<16x32xf32> to vector<16x32xbf16>
    %cst_87 = arith.constant dense<0.000000e+00> : vector<16x64xf32>
    %232 = tpu.matmul %231, %20, %cst_87 {dimension_numbers = #tpu.dot_dimension_numbers<[1], [0], [0], [1], [0, 0, 1, 1], [], []>} : vector<16x32xbf16>, vector<32x64xbf16>, vector<16x64xf32> -> vector<16x64xf32>
    %233 = arith.addf %232, %23 : vector<16x64xf32>
    %cst_88 = arith.constant 5.000000e-01 : f32
    %234 = vector.broadcast %cst_88 : f32 to vector<16x64xf32>
    %235 = arith.mulf %234, %233 : vector<16x64xf32>
    %cst_89 = arith.constant 4.471500e-02 : f32
    %236 = vector.broadcast %cst_89 : f32 to vector<16x64xf32>
    %237 = arith.mulf %236, %233 : vector<16x64xf32>
    %238 = arith.mulf %237, %233 : vector<16x64xf32>
    %239 = arith.mulf %238, %233 : vector<16x64xf32>
    %240 = arith.addf %233, %239 : vector<16x64xf32>
    %cst_90 = arith.constant 0.797884583 : f32
    %241 = vector.broadcast %cst_90 : f32 to vector<16x64xf32>
    %242 = arith.mulf %241, %240 : vector<16x64xf32>
    %243 = math.tanh %242 : vector<16x64xf32>
    %cst_91 = arith.constant 1.000000e+00 : f32
    %244 = vector.broadcast %cst_91 : f32 to vector<16x64xf32>
    %245 = arith.addf %244, %243 : vector<16x64xf32>
    %246 = arith.mulf %235, %245 : vector<16x64xf32>
    %247 = arith.truncf %246 : vector<16x64xf32> to vector<16x64xbf16>
    %cst_92 = arith.constant dense<0.000000e+00> : vector<16x32xf32>
    %248 = tpu.matmul %247, %24, %cst_92 {dimension_numbers = #tpu.dot_dimension_numbers<[1], [0], [0], [1], [0, 0, 1, 1], [], []>} : vector<16x64xbf16>, vector<64x32xbf16>, vector<16x32xf32> -> vector<16x32xf32>
    %249 = arith.addf %248, %27 : vector<16x32xf32>
    %250 = arith.addf %230, %249 : vector<16x32xf32>
    %cst_93 = arith.constant dense<0.000000e+00> : vector<16xf32>
    %251 = vector.multi_reduction <add>, %250, %cst_93 [1] : vector<16x32xf32> to vector<16xf32>
    %252 = vector.shape_cast %251 : vector<16xf32> to vector<16x1xf32>
    %cst_94 = arith.constant 3.200000e+01 : f32
    %253 = vector.broadcast %cst_94 : f32 to vector<16x1xf32>
    %254 = arith.divf %252, %253 : vector<16x1xf32>
    %255 = vector.broadcast %254 : vector<16x1xf32> to vector<16x32xf32>
    %256 = arith.subf %250, %255 : vector<16x32xf32>
    %257 = arith.mulf %256, %256 : vector<16x32xf32>
    %cst_95 = arith.constant dense<0.000000e+00> : vector<16xf32>
    %258 = vector.multi_reduction <add>, %257, %cst_95 [1] : vector<16x32xf32> to vector<16xf32>
    %259 = vector.shape_cast %258 : vector<16xf32> to vector<16x1xf32>
    %cst_96 = arith.constant 3.200000e+01 : f32
    %260 = vector.broadcast %cst_96 : f32 to vector<16x1xf32>
    %261 = arith.divf %259, %260 : vector<16x1xf32>
    %cst_97 = arith.constant 9.99999996E-13 : f32
    %262 = vector.broadcast %cst_97 : f32 to vector<16x1xf32>
    %263 = arith.addf %261, %262 : vector<16x1xf32>
    %264 = math.rsqrt %263 : vector<16x1xf32>
    %265 = vector.broadcast %264 : vector<16x1xf32> to vector<16x32xf32>
    %266 = arith.mulf %256, %265 : vector<16x32xf32>
    %267 = arith.mulf %266, %30 : vector<16x32xf32>
    %268 = arith.addf %267, %33 : vector<16x32xf32>
    %269 = arith.truncf %268 : vector<16x32xf32> to vector<16x32xbf16>
    %c0_98 = arith.constant 0 : index
    %c0_99 = arith.constant 0 : index
    %270 = vector.load %arg22[%c0_98, %c0_99] : memref<32x32xbf16, #tpu.memory_space<vmem>>, vector<32x32xbf16>
    %cst_100 = arith.constant dense<0.000000e+00> : vector<16x32xf32>
    %271 = tpu.matmul %269, %270, %cst_100 {dimension_numbers = #tpu.dot_dimension_numbers<[1], [0], [0], [1], [0, 0, 1, 1], [], []>} : vector<16x32xbf16>, vector<32x32xbf16>, vector<16x32xf32> -> vector<16x32xf32>
    %c0_101 = arith.constant 0 : index
    %c0_102 = arith.constant 0 : index
    %272 = vector.load %arg23[%c0_101, %c0_102] : memref<1x32xf32, #tpu.memory_space<vmem>>, vector<1x32xf32>
    %273 = vector.broadcast %272 : vector<1x32xf32> to vector<16x32xf32>
    %274 = arith.addf %271, %273 : vector<16x32xf32>
    %cst_103 = arith.constant 5.000000e-01 : f32
    %275 = vector.broadcast %cst_103 : f32 to vector<16x32xf32>
    %276 = arith.mulf %275, %274 : vector<16x32xf32>
    %cst_104 = arith.constant 4.471500e-02 : f32
    %277 = vector.broadcast %cst_104 : f32 to vector<16x32xf32>
    %278 = arith.mulf %277, %274 : vector<16x32xf32>
    %279 = arith.mulf %278, %274 : vector<16x32xf32>
    %280 = arith.mulf %279, %274 : vector<16x32xf32>
    %281 = arith.addf %274, %280 : vector<16x32xf32>
    %cst_105 = arith.constant 0.797884583 : f32
    %282 = vector.broadcast %cst_105 : f32 to vector<16x32xf32>
    %283 = arith.mulf %282, %281 : vector<16x32xf32>
    %284 = math.tanh %283 : vector<16x32xf32>
    %cst_106 = arith.constant 1.000000e+00 : f32
    %285 = vector.broadcast %cst_106 : f32 to vector<16x32xf32>
    %286 = arith.addf %285, %284 : vector<16x32xf32>
    %287 = arith.mulf %276, %286 : vector<16x32xf32>
    %c0_107 = arith.constant 0 : index
    %c0_108 = arith.constant 0 : index
    %288 = vector.load %arg24[%c0_107, %c0_108] : memref<1x32xf32, #tpu.memory_space<vmem>>, vector<1x32xf32>
    %c0_109 = arith.constant 0 : index
    %c0_110 = arith.constant 0 : index
    %289 = vector.load %arg25[%c0_109, %c0_110] : memref<1x32xf32, #tpu.memory_space<vmem>>, vector<1x32xf32>
    %cst_111 = arith.constant dense<0.000000e+00> : vector<16xf32>
    %290 = vector.multi_reduction <add>, %287, %cst_111 [1] : vector<16x32xf32> to vector<16xf32>
    %291 = vector.shape_cast %290 : vector<16xf32> to vector<16x1xf32>
    %cst_112 = arith.constant 3.200000e+01 : f32
    %292 = vector.broadcast %cst_112 : f32 to vector<16x1xf32>
    %293 = arith.divf %291, %292 : vector<16x1xf32>
    %294 = vector.broadcast %293 : vector<16x1xf32> to vector<16x32xf32>
    %295 = arith.subf %287, %294 : vector<16x32xf32>
    %296 = arith.mulf %295, %295 : vector<16x32xf32>
    %cst_113 = arith.constant dense<0.000000e+00> : vector<16xf32>
    %297 = vector.multi_reduction <add>, %296, %cst_113 [1] : vector<16x32xf32> to vector<16xf32>
    %298 = vector.shape_cast %297 : vector<16xf32> to vector<16x1xf32>
    %cst_114 = arith.constant 3.200000e+01 : f32
    %299 = vector.broadcast %cst_114 : f32 to vector<16x1xf32>
    %300 = arith.divf %298, %299 : vector<16x1xf32>
    %cst_115 = arith.constant 9.99999996E-13 : f32
    %301 = vector.broadcast %cst_115 : f32 to vector<16x1xf32>
    %302 = arith.addf %300, %301 : vector<16x1xf32>
    %303 = math.rsqrt %302 : vector<16x1xf32>
    %304 = vector.broadcast %303 : vector<16x1xf32> to vector<16x32xf32>
    %305 = arith.mulf %295, %304 : vector<16x32xf32>
    %306 = vector.broadcast %288 : vector<1x32xf32> to vector<16x32xf32>
    %307 = arith.mulf %305, %306 : vector<16x32xf32>
    %308 = vector.broadcast %289 : vector<1x32xf32> to vector<16x32xf32>
    %309 = arith.addf %307, %308 : vector<16x32xf32>
    %310 = arith.truncf %309 : vector<16x32xf32> to vector<16x32xbf16>
    %c0_116 = arith.constant 0 : index
    %c0_117 = arith.constant 0 : index
    %311 = vector.load %arg26[%c0_116, %c0_117] : memref<32x128xbf16, #tpu.memory_space<vmem>>, vector<32x128xbf16>
    %cst_118 = arith.constant dense<0.000000e+00> : vector<16x128xf32>
    %312 = tpu.matmul %310, %311, %cst_118 {dimension_numbers = #tpu.dot_dimension_numbers<[1], [0], [0], [1], [0, 0, 1, 1], [], []>} : vector<16x32xbf16>, vector<32x128xbf16>, vector<16x128xf32> -> vector<16x128xf32>
    %c0_119 = arith.constant 0 : index
    %c0_120 = arith.constant 0 : index
    %313 = vector.load %arg27[%c0_119, %c0_120] : memref<1x128xf32, #tpu.memory_space<vmem>>, vector<1x128xf32>
    %314 = vector.broadcast %313 : vector<1x128xf32> to vector<16x128xf32>
    %315 = arith.addf %312, %314 : vector<16x128xf32>
    %c0_121 = arith.constant 0 : index
    %c0_122 = arith.constant 0 : index
    %316 = vector.load %arg28[%c0_121, %c0_122] : memref<16x128xf32, #tpu.memory_space<vmem>>, vector<16x128xf32>
    tpu.vector_store %arg28[%c0_121, %c0_122], %315 {strides = array<i32>} : memref<16x128xf32, #tpu.memory_space<vmem>>, vector<16x128xf32>,
    return
  }
}

</mosaic_0001>

<bundles_post_ra>
// kernel: tpu_custom_call.1
= control target key start
LH: loop header
LB: loop body
LE: loop exit
PB: predicated region body
PF: predicated region fallthrough
CT: control target
= control target key end

     0   :  { %s2654_s0 = inlined_call_operand.vmem [shape: f32[16,8], index: 0, kind: input, shape index: {}]   ;;  %s2655_s1 = inlined_call_operand.vmem [shape: f32[16,32], index: 1, kind: input, shape index: {}]   ;;  %s2656_s2 = inlined_call_operand.vmem [shape: bf16[32,4], index: 2, kind: input, shape index: {}]   ;;  %s2657_s3 = inlined_call_operand.hbm [shape: bf16[4,32], index: 3, kind: input, shape index: {}]   ;;  %s2658_s4 = inlined_call_operand.hbm [shape: bf16[8,32], index: 4, kind: input, shape index: {}]   ;;  %s2659_s5 = inlined_call_operand.hbm [shape: f32[1,32], index: 5, kind: input, shape index: {}]   ;;  %s2660_s6 = inlined_call_operand.hbm [shape: f32[1,32], index: 6, kind: input, shape index: {}]   ;;  %s2661_s7 = inlined_call_operand.vmem [shape: f32[1,32], index: 7, kind: input, shape index: {}]   ;;  %s2662_s8 = inlined_call_operand.vmem [shape: bf16[32,96], index: 8, kind: input, shape index: {}]   ;;  %s2663_s9 = inlined_call_operand.vmem [shape: f32[1,96], index: 9, kind: input, shape index: {}]   ;;  %s2664_s10 = inlined_call_operand.vmem [shape: bf16[32,32], index: 10, kind: input, shape index: {}]   ;;  %s2665_s11 = inlined_call_operand.vmem [shape: f32[1,32], index: 11, kind: input, shape index: {}]   ;;  %s2666_s12 = inlined_call_operand.vmem [shape: bf16[32,32], index: 12, kind: input, shape index: {}]   ;;  %s2667_s13 = inlined_call_operand.vmem [shape: f32[1,32], index: 13, kind: input, shape index: {}]   ;;  %s2668_s14 = inlined_call_operand.vmem [shape: f32[1,32], index: 14, kind: input, shape index: {}]   ;;  %s2669_s15 = inlined_call_operand.vmem [shape: f32[1,32], index: 15, kind: input, shape index: {}]   ;;  %s2670_s16 = inlined_call_operand.vmem [shape: bf16[32,64], index: 16, kind: input, shape index: {}]   ;;  %s2671_s17 = inlined_call_operand.vmem [shape: f32[1,64], index: 17, kind: input, shape index: {}]   ;;  %s2672_s18 = inlined_call_operand.vmem [shape: bf16[64,32], index: 18, kind: input, shape index: {}]   ;;  %s2673_s19 = inlined_call_operand.vmem [shape: f32[1,32], index: 19, kind: input, shape index: {}]   ;;  %s2674_s20 = inlined_call_operand.vmem [shape: f32[1,32], index: 20, kind: input, shape index: {}]   ;;  %s2675_s21 = inlined_call_operand.vmem [shape: f32[1,32], index: 21, kind: input, shape index: {}]   ;;  %s2676_s22 = inlined_call_operand.vmem [shape: bf16[32,32], index: 22, kind: input, shape index: {}]   ;;  %s2677_s23 = inlined_call_operand.vmem [shape: f32[1,32], index: 23, kind: input, shape index: {}]   ;;  %s2678_s24 = inlined_call_operand.vmem [shape: f32[1,32], index: 24, kind: input, shape index: {}]   ;;  %s2679_s25 = inlined_call_operand.vmem [shape: f32[1,32], index: 25, kind: input, shape index: {}]   ;;  %s2680_s26 = inlined_call_operand.vmem [shape: bf16[32,128], index: 26, kind: input, shape index: {}]   ;;  %s2681_s27 = inlined_call_operand.vmem [shape: f32[1,128], index: 27, kind: input, shape index: {}]   ;;  %s2682_s28 = inlined_call_operand.hbm [shape: f32[16,128], index: 28, kind: output, shape index: {}]  }
   0x1   :  { %2694 = sst [smem:[#allocation15_spill]] %s2654_s0 }
   0x2   :  { %2695 = sst [smem:[#allocation16_spill]] %s2655_s1 }
   0x3   :  { %2696 = sst [smem:[#allocation17_spill]] %s2656_s2 }
   0x4   :  { %2697 = sst [smem:[#allocation18_spill]] %s2657_s3 }
   0x5   :  { %2698 = sst [smem:[#allocation19_spill]] %s2658_s4 }
   0x6   :  { %2699 = sst [smem:[#allocation20_spill]] %s2659_s5 }
   0x7   :  { %2700 = sst [smem:[#allocation21_spill]] %s2660_s6 }
   0x8   :  { %2701 = sst [smem:[#allocation22_spill]] %s2661_s7 }
   0x9   :  { %2702 = sst [smem:[#allocation23_spill]] %s2662_s8 }
   0xa   :  { %2703 = sst [smem:[#allocation24_spill]] %s2663_s9 }
   0xb   :  { %2704 = sst [smem:[#allocation25_spill]] %s2664_s10 }
   0xc   :  { %2705 = sst [smem:[#allocation26_spill]] %s2665_s11 }
   0xd   :  { %2706 = sst [smem:[#allocation27_spill]] %s2666_s12 }
   0xe   :  { %2707 = sst [smem:[#allocation28_spill]] %s2682_s28 }
   0xf   :  { %33 = vsyncpa [#allocation3], 0 }
  0x10   :  { %34 = vsyncpa [#allocation6], 0 }
  0x11   :  { %35 = vsyncpa [#allocation9], 0 }
  0x12   :  { %36 = vsyncpa [#allocation4], 0  ;;  %s2073_s8 = smov [#allocation5]   ;;  %s2074_s9 = smov [#allocation2]  }
  0x13   :  { %s59_s5 = sshll.u32 %s2073_s8, 4  ;;  %s49_s30 = sshll.u32 %s2074_s9, 4  ;;  %s60_s5 = int_to_ptr.vmem [resolvable:$true] %s59_s5  ;;  %s50_s30 = int_to_ptr.vmem [resolvable:$true] %s49_s30 }
  0x14   :  { %s2708_s10 = sld [smem:[#allocation19_spill]] }
  0x1a   :  { %s1955_s0 = scalar_lea.hbm %s2708_s10, 64 }
  0x1b   :  { %p1956_p0 = scmp.ne.s32.totalorder %s2708_s10, %s1955_s0  ;;  %p1959_p1 = scmp.lt.u32.totalorder %s1955_s0, %s2708_s10 }
  0x1d   :  { %p1961_p2 = pnand %p1959_p1, %p1956_p0 }
  0x1f   :  { %1964 = shalt.err (!%p1961_p2)
}
  0x20   :  { %s1965_s12 = scalar_lea.vmem %s60_s5, 64  ;;  %p1970_p4 = scmp.lt.s32.totalorder %s60_s5, %s60_s5 }
  0x21   :  { %p1966_p3 = scmp.ne.s32.totalorder %s60_s5, %s1965_s12  ;;  %p1971_p5 = scmp.lt.s32.totalorder %s1965_s12, %s1965_s12 }
  0x23   :  { %p1972_p6 = por %p1971_p5, %p1970_p4 }
  0x25   :  { %p1973_p7 = pnand %p1972_p6, %p1966_p3 }
  0x27   :  { %1976 = shalt.err (!%p1973_p7)
}
  0x28   :  { %62 = dma.hbm_to_vmem [thread:$0]  %s2708_s10, 64, %s60_s5, [#allocation6]  }
  0x29   :  { %s2709_s3 = sld [smem:[#allocation18_spill]] }
  0x2f   :  { %s1977_s6 = scalar_lea.hbm %s2709_s3, 32 }
  0x30   :  { %p1978_p8 = scmp.ne.s32.totalorder %s2709_s3, %s1977_s6  ;;  %p1981_p9 = scmp.lt.u32.totalorder %s1977_s6, %s2709_s3 }
  0x32   :  { %p1983_p10 = pnand %p1981_p9, %p1978_p8 }
  0x34   :  { %1986 = shalt.err (!%p1983_p10)
}
  0x35   :  { %s1987_s7 = scalar_lea.vmem %s50_s30, 32  ;;  %p1992_p12 = scmp.lt.s32.totalorder %s50_s30, %s50_s30 }
  0x36   :  { %p1988_p11 = scmp.ne.s32.totalorder %s50_s30, %s1987_s7  ;;  %p1993_p13 = scmp.lt.s32.totalorder %s1987_s7, %s1987_s7 }
  0x38   :  { %p1994_p0 = por %p1993_p13, %p1992_p12 }
  0x3a   :  { %p1995_p1 = pnand %p1994_p0, %p1988_p11 }
  0x3c   :  { %1998 = shalt.err (!%p1995_p1)
}
  0x3d   :  { %52 = dma.hbm_to_vmem [thread:$0]  %s2709_s3, 32, %s50_s30, [#allocation3]  }
  0x3e   :  { %s2075_s12 = smov [#allocation7]   ;;  %s2076_s4 = smov [#allocation8]  }
  0x3f   :  { %s69_s1 = sshll.u32 %s2075_s12, 4  ;;  %s79_s8 = sshll.u32 %s2076_s4, 4  ;;  %s70_s1 = int_to_ptr.vmem [resolvable:$true] %s69_s1  ;;  %s80_s8 = int_to_ptr.vmem [resolvable:$true] %s79_s8 }
  0x40   :  { %s2710_s11 = sld [smem:[#allocation20_spill]] }
  0x46   :  { %s1999_s29 = scalar_lea.hbm %s2710_s11, 16 }
  0x47   :  { %p2000_p2 = scmp.ne.s32.totalorder %s2710_s11, %s1999_s29  ;;  %p2003_p3 = scmp.lt.u32.totalorder %s1999_s29, %s2710_s11 }
  0x49   :  { %p2005_p4 = pnand %p2003_p3, %p2000_p2 }
  0x4b   :  { %2008 = shalt.err (!%p2005_p4)
}
  0x4c   :  { %s2009_s30 = scalar_lea.vmem %s70_s1, 16  ;;  %s2013_s3 = scalar_lea.vmem %s70_s1, 32 }
  0x4d   :  { %p2010_p5 = scmp.ne.s32.totalorder %s70_s1, %s2009_s30  ;;  %p2014_p6 = scmp.lt.s32.totalorder %s70_s1, %s70_s1 }
  0x4e   :  { %p2015_p7 = scmp.lt.s32.totalorder %s2013_s3, %s2009_s30 }
  0x50   :  { %p2016_p8 = por %p2015_p7, %p2014_p6 }
  0x52   :  { %p2017_p9 = pnand %p2016_p8, %p2010_p5 }
  0x54   :  { %2020 = shalt.err (!%p2017_p9)
}
  0x55   :  { %72 = dma.hbm_to_vmem [thread:$0]  %s2710_s11, 16, %s70_s1, [#allocation6]  }
  0x56   :  { %s2711_s9 = sld [smem:[#allocation21_spill]] }
  0x5c   :  { %s2021_s6 = scalar_lea.hbm %s2711_s9, 16 }
  0x5d   :  { %p2022_p10 = scmp.ne.s32.totalorder %s2711_s9, %s2021_s6  ;;  %p2025_p11 = scmp.lt.u32.totalorder %s2021_s6, %s2711_s9 }
  0x5f   :  { %p2027_p12 = pnand %p2025_p11, %p2022_p10 }
  0x61   :  { %2030 = shalt.err (!%p2027_p12)
}
  0x62   :  { %s2031_s7 = scalar_lea.vmem %s80_s8, 16  ;;  %s2035_s30 = scalar_lea.vmem %s80_s8, 32 }
  0x63   :  { %p2032_p13 = scmp.ne.s32.totalorder %s80_s8, %s2031_s7  ;;  %p2036_p0 = scmp.lt.s32.totalorder %s80_s8, %s80_s8 }
  0x64   :  { %p2037_p1 = scmp.lt.s32.totalorder %s2035_s30, %s2031_s7 }
  0x66   :  { %p2038_p2 = por %p2037_p1, %p2036_p0 }
  0x68   :  { %p2039_p3 = pnand %p2038_p2, %p2032_p13 }
  0x6a   :  { %2042 = shalt.err (!%p2039_p3)
}
  0x6b   :  { %82 = dma.hbm_to_vmem [thread:$0]  %s2711_s9, 16, %s80_s8, [#allocation9]  }
  0x6c   :  { %2065 = dma.done.wait [#allocation3], 32  }
  0x6d   :  { %2066 = vsyncadd [#allocation3], 4294967264 }
  0x6e   :  { %2067 = dma.done.wait [#allocation6], 80  }
  0x6f   :  { %2068 = vsyncadd [#allocation6], 4294967216 }
  0x70   :  { %2069 = dma.done.wait [#allocation9], 16  }
  0x71   :  { %2070 = vsyncadd [#allocation9], 4294967280  ;;  %v2077_v0 = vmov 0.0   ;;  %vm2078_vm0 = vmmov 0   ;;  %vm245_vm1 = vcmask 1043456   ;;  %s2712_s5 = sld [smem:[#allocation15_spill]] }
  0x72   :  { %1726 = vmatprep.subr.bf16.mxu0 %v2077_v0  ;;  %1728 = vmatprep.mubr.msk.bf16.mxu0 %vm2078_vm0, %v2077_v0  ;;  %v233_v1 = vld [vmem:[#allocation5] sm:$0xf]  ;;  %vm241_vm2 = vcmask 64512   ;;  %v1624_v6 = vld [vmem:[#allocation7] ss:$0 sm:$0xff]  ;;  %s2713_s6 = sld [smem:[#allocation16_spill]] }
  0x73   :  { %1732 = vmatprep.subr.bf16.mxu1 %v2077_v0  ;;  %1736 = vmatprep.mubr.msk.bf16.mxu1 %vm2078_vm0, %v2077_v0  ;;  %v247_v4 = vsel %vm245_vm1, %v233_v1, 0  ;;  %vm296_vm3 = vcmask 261120   ;;  %s2714_s7 = sld [smem:[#allocation23_spill]]  ;;  %v1626_v39 = vld [vmem:[#allocation8] ss:$0 sm:$0xff]  ;;  %s2715_s3 = sld [smem:[#allocation22_spill]] }
  0x74   :  { %1727 = vmatpush3.bf16.msra.mxu0 %v247_v4  ;;  %s2716_s12 = sld [smem:[#allocation17_spill]]  ;;  %s2717_s29 = sld [smem:[#allocation24_spill]]  ;;  %vm521_vm4 = vcmask 1041408   ;;  %vm482_vm5 = vcmask 31744   ;;  %vm836_vm6 = vcmask 523264  }
  0x75   :  { %s2079_s0 = smov 96   ;;  %s2080_s2 = smov 64  }
  0x76   :  { %s2718_s1 = sld [smem:[#allocation25_spill]]  ;;  %s2719_s10 = sld [smem:[#allocation27_spill]] }
  0x77   :  { %v230_v2 = vld [vmem:[%s2712_s5] sm:$0xff]  ;;  %v231_v3 = vld [vmem:[%s2712_s5 + $0x8] sm:$0xff]  ;;  %s2720_s28 = sld [smem:[#allocation26_spill]]  ;;  %s2081_s4 = smov [#allocation10]  }
  0x78   :  { %v232_v5 = vpack.c.bf16 %v231_v3, %v230_v2  ;;  %v290_v8 = vld [vmem:[%s2713_s6] sm:$0xff]  ;;  %v291_v12 = vld [vmem:[%s2713_s6 + $0x8] sm:$0xff]  ;;  %v2346_v2 = vld [vmem:[#allocation2] sm:$0x3] }
  0x79   :  { %v2302_v29 = vld [vmem:[%s2714_s7] sm:$0xff]   ;;  %v2308_v30 = vld [vmem:[%s2714_s7 + $0x8] sm:$0xff]   ;;  %v2352_v3 = vsel %vm521_vm4, %v2346_v2, 0 }
  0x7a   :  { %1729 = vmatmul.mubr.msk.bf16.vlgmr.msra.gmra.mrb[0].mxu0 %vm241_vm2, %v232_v5  ;;  %1733 = vmatpush3.bf16.msra.mxu1 %v2302_v29  ;;  %v1627_v43 = vld [vmem:[%s2715_s3] ss:$0 sm:$0xff]  ;;  %v2326_v49 = vld [vmem:[%s2716_s12 + $0x8] sm:$0xff]  }
  0x7b   :  { %1734 = vmatprep.subr.bf16.mxu1 %v2077_v0  ;;  %v2319_v48 = vld [vmem:[%s2716_s12] sm:$0xff]  }
  0x7c   :  { %1740 = vmatprep.subr.bf16.mxu0 %v2319_v48  ;;  %v2334_v50 = vld [vmem:[%s2717_s29] ss:$0 sm:$0xff] }
  0x7d   :  { %1741 = vmatpush3.bf16.msra.mxu0 %v2319_v48 }
  0x7e   :  { %1735 = vmatpush3.bf16.msra.mxu1 %v2308_v30  ;;  %1742 = vmatprep.subr.bf16.mxu0 %v2326_v49 }
  0x7f   :  { %1864 = vmatprep.subr.msk.bf16.mxu1 %vm521_vm4, %v2346_v2 }
  0x81   :  { %1743 = vmatpush3.bf16.msra.mxu0 %v2326_v49 }
  0x82   :  { %1754 = vmatprep.subr.bf16.mxu0 %v2077_v0 }
 0x14d   :  { %v283_v7 = vpop.f32.mrb[0].mxu0 }
 0x14e   :  { %v284_v9 = vadd.f32 %v1624_v6, %v283_v7  ;;  %v1730_v10 = vpop.f32.mrb[1].mxu0 }
 0x14f   :  { %v286_v11 = vpop.f32.mrb[2].mxu0 }
 0x150   :  { %v287_v13 = vadd.f32 %v1624_v6, %v286_v11  ;;  %v1731_v14 = vpop.f32.mrb[3].mxu0  ;;  %v292_v15 = vadd.f32 %v290_v8, %v284_v9 }
 0x152   :  { %v297_v16 = vsel %vm296_vm3, %v292_v15, 0.0  ;;  %v293_v17 = vadd.f32 %v291_v12, %v287_v13 }
 0x153   :  { %298 = vadd.xlane.f32.xlu0 %v297_v16 }
 0x154   :  { %v300_v18 = vsel %vm296_vm3, %v293_v17, 0.0 }
 0x157   :  { %301 = vadd.xlane.f32.xlu0 %v300_v18 }
 0x1e0   :  { %v299_v19 = vpop.xlane.xlu0 %298 }
 0x1e1   :  { %v304_v20 = vmul.f32 0.03125, %v299_v19 }
 0x1e3   :  { %v306_v21 = vsub.f32 %v292_v15, %v304_v20 }
 0x1e4   :  { %v302_v22 = vpop.xlane.xlu0 %301 }
 0x1e5   :  { %v305_v23 = vmul.f32 0.03125, %v302_v22  ;;  %v308_v24 = vmul.f32 %v306_v21, %v306_v21 }
 0x1e7   :  { %v307_v25 = vsub.f32 %v293_v17, %v305_v23  ;;  %v310_v26 = vsel %vm296_vm3, %v308_v24, 0.0 }
 0x1e8   :  { %311 = vadd.xlane.f32.xlu1 %v310_v26 }
 0x1e9   :  { %v309_v27 = vmul.f32 %v307_v25, %v307_v25 }
 0x1eb   :  { %v313_v28 = vsel %vm296_vm3, %v309_v27, 0.0 }
 0x1ec   :  { %314 = vadd.xlane.f32.xlu1 %v313_v28 }
 0x275   :  { %v312_v31 = vpop.xlane.xlu1 %311 }
 0x276   :  { %v316_v32 = vmul.f32 0.03125, %v312_v31 }
 0x278   :  { %v318_v33 = vadd.f32 1e-12, %v316_v32 }
 0x279   :  { %v315_v34 = vpop.xlane.xlu1 %314 }
 0x27a   :  { %1895 = vrsqrt.f32 %v318_v33  ;;  %v317_v35 = vmul.f32 0.03125, %v315_v34 }
 0x27c   :  { %v319_v36 = vadd.f32 1e-12, %v317_v35 }
 0x27e   :  { %1897 = vrsqrt.f32 %v319_v36 }
 0x284   :  { %v1896_v37 = vpop.eup %1895 }
 0x285   :  { %v322_v38 = vmul.f32 %v1896_v37, %v306_v21 }
 0x287   :  { %v330_v42 = vmul.f32 %v1626_v39, %v322_v38 }
 0x288   :  { %v1898_v40 = vpop.eup %1897 }
 0x289   :  { %v323_v41 = vmul.f32 %v1898_v40, %v307_v25  ;;  %v338_v45 = vadd.f32 %v1627_v43, %v330_v42 }
 0x28b   :  { %v331_v44 = vmul.f32 %v1626_v39, %v323_v41 }
 0x28d   :  { %v339_v46 = vadd.f32 %v1627_v43, %v331_v44 }
 0x28f   :  { %v340_v47 = vpack.c.bf16 %v339_v46, %v338_v45  ;;  %v2371_v46 = vld [vmem:[%s2718_s1] sm:$0xff]  }
 0x291   :  { %1737 = vmatmul.mubr.msk.bf16.vlgmr.msra.gmra.mrb[0].mxu1 %vm296_vm3, %v340_v47  ;;  %v2378_v47 = vld [vmem:[%s2718_s1 + $0x8] sm:$0xff]  }
 0x292   :  { %1749 = vmatpush3.bf16.msra.mxu1 %v2352_v3 }
 0x293   :  { %1762 = vmatprep.subr.bf16.mxu1 %v2077_v0 }
 0x364   :  { %v390_v51 = vpop.f32.mrb[0].mxu1 }
 0x365   :  { %v391_v52 = vadd.f32 %v2334_v50, %v390_v51  ;;  %v1738_v53 = vpop.f32.mrb[1].mxu1  ;;  %v2385_v51 = vld [vmem:[%s2719_s10] sm:$0xff]  }
 0x366   :  { %v393_v54 = vpop.f32.mrb[2].mxu1 }
 0x367   :  { %v394_v55 = vadd.f32 %v2334_v50, %v393_v54  ;;  %399 = vrot.lane.b32.xlu0 %v391_v52, %s2079_s0  ;;  %v1739_v56 = vpop.f32.mrb[3].mxu1 }
 0x369   :  { %401 = vrot.lane.b32.xlu1 %v394_v55, %s2079_s0 }
 0x36d   :  { %574 = vrot.lane.b32.xlu1 %v391_v52, %s2080_s2 }
 0x371   :  { %576 = vrot.lane.b32.xlu1 %v394_v55, %s2080_s2 }
 0x3d9   :  { %v400_v57 = vpop.permute.xlu0 %399 }
 0x3da   :  { %v405_v59 = vmul.f32 %v400_v57, %v391_v52  ;;  %v407_v60 = vmul.f32 %v400_v57, %v394_v55 }
 0x3db   :  { %v402_v58 = vpop.permute.xlu1 %401 }
 0x3dc   :  { %v406_v61 = vmul.f32 %v402_v58, %v391_v52  ;;  %v408_v62 = vmul.f32 %v402_v58, %v394_v55 }
 0x3de   :  { %v409_v63 = vpack.c.bf16 %v406_v61, %v405_v59  ;;  %v410_v1 = vpack.c.bf16 %v408_v62, %v407_v60 }
 0x3df   :  { %v575_v52 = vpop.permute.xlu1 %574 }
 0x3e0   :  { %1744 = vmatprep.mubr.msk.bf16.mxu0 %vm296_vm3, %v409_v63 }
 0x3e1   :  { %1745 = vmatmul.mubr.msk.bf16.vlgmr.msra.gmra.mrb[4].mxu0 %vm296_vm3, %v410_v1 }
 0x3e2   :  { %1758 = vmatprep.mubr.msk.bf16.mxu0 %vm2078_vm0, %v2077_v0  ;;  %1755 = vmatpush3.bf16.msra.mxu0 %v2371_v46 }
 0x3e3   :  { %1756 = vmatprep.subr.bf16.mxu0 %v2077_v0  ;;  %v577_v56 = vpop.permute.xlu1 %576 }
 0x3e6   :  { %1757 = vmatpush3.bf16.msra.mxu0 %v2378_v47 }
 0x3e7   :  { %1770 = vmatprep.subr.bf16.mxu0 %v2077_v0 }
 0x4b4   :  { %v1746_v4 = vpop.f32.mrb[4].mxu0 }
 0x4b5   :  { %v480_v5 = vmul.f32 0.35355338, %v1746_v4  ;;  %v463_v6 = vpop.f32.mrb[5].mxu0 }
 0x4b6   :  { %v478_v7 = vmul.f32 0.35355338, %v463_v6  ;;  %v1747_v8 = vpop.f32.mrb[6].mxu0 }
 0x4b7   :  { %v481_v9 = vmul.f32 0.35355338, %v1747_v8  ;;  %v466_v10 = vpop.f32.mrb[7].mxu0  ;;  %v486_v12 = vsel %vm482_vm5, %v480_v5, -inf  ;;  %v2399_v8 = vld [vmem:[%s2719_s10 + $0x8] sm:$0xff]  }
 0x4b8   :  { %v479_v11 = vmul.f32 0.35355338, %v466_v10  ;;  %v483_v14 = vsel %vm482_vm5, %v478_v7, -inf }
 0x4b9   :  { %v487_v13 = vsel %vm482_vm5, %v481_v9, -inf }
 0x4ba   :  { %v488_v15 = vmax.f32 %v486_v12, %v487_v13  ;;  %v484_v16 = vsel %vm482_vm5, %v479_v11, -inf }
 0x4bb   :  { %v485_v17 = vmax.f32 %v483_v14, %v484_v16 }
 0x4bc   :  { %v491_v18 = vsub.f32 %v480_v5, %v488_v15  ;;  %v492_v19 = vsub.f32 %v481_v9, %v488_v15  ;;  %v2406_v9 = vld [vmem:[%s2720_s28] ss:$0 sm:$0xff] }
 0x4bd   :  { %v489_v20 = vsub.f32 %v478_v7, %v485_v17  ;;  %v490_v21 = vsub.f32 %v479_v11, %v485_v17  ;;  %v2416_v17 = vld [vmem:[%s2667_s13] ss:$0 sm:$0xff] }
 0x4be   :  { %v497_v22 = vmul.f32 1.442695, %v491_v18  ;;  %v499_v23 = vmul.f32 1.442695, %v492_v19 }
 0x4bf   :  { %v493_v24 = vmul.f32 1.442695, %v489_v20  ;;  %v495_v25 = vmul.f32 1.442695, %v490_v21 }
 0x4c0   :  { %1899 = vpow2.f32 %v497_v22 }
 0x4c1   :  { %1901 = vpow2.f32 %v499_v23 }
 0x4c2   :  { %1903 = vpow2.f32 %v493_v24 }
 0x4c3   :  { %1905 = vpow2.f32 %v495_v25 }
 0x4ca   :  { %v1900_v26 = vpop.eup %1899 }
 0x4cb   :  { %v1902_v27 = vpop.eup %1901  ;;  %v504_v28 = vsel %vm482_vm5, %v1900_v26, 0.0 }
 0x4cc   :  { %v1904_v31 = vpop.eup %1903  ;;  %v505_v32 = vsel %vm482_vm5, %v1902_v27, 0.0 }
 0x4cd   :  { %v1906_v33 = vpop.eup %1905  ;;  %v506_v34 = vadd.f32 %v505_v32, %v504_v28  ;;  %v501_v35 = vsel %vm482_vm5, %v1904_v31, 0.0 }
 0x4ce   :  { %v502_v36 = vsel %vm482_vm5, %v1906_v33, 0.0 }
 0x4cf   :  { %1907 = vrcp.f32 %v506_v34  ;;  %v503_v37 = vadd.f32 %v502_v36, %v501_v35 }
 0x4d1   :  { %1909 = vrcp.f32 %v503_v37 }
 0x4d9   :  { %v1908_v38 = vpop.eup %1907 }
 0x4da   :  { %v511_v39 = vmul.f32 %v1908_v38, %v1900_v26  ;;  %v512_v40 = vmul.f32 %v1908_v38, %v1902_v27 }
 0x4db   :  { %v1910_v41 = vpop.eup %1909 }
 0x4dc   :  { %v509_v42 = vmul.f32 %v1910_v41, %v1904_v31  ;;  %v510_v43 = vmul.f32 %v1910_v41, %v1906_v33  ;;  %v514_v44 = vpack.c.bf16 %v512_v40, %v511_v39  ;;  %v2427_v40 = vld [vmem:[%s2670_s16] sm:$0xff]   ;;  %v2434_v41 = vld [vmem:[%s2670_s16 + $0x8] sm:$0xff]  }
 0x4de   :  { %v513_v45 = vpack.c.bf16 %v510_v43, %v509_v42 }
 0x4e0   :  { %1750 = vmatprep.mubr.msk.bf16.mxu1 %vm482_vm5, %v513_v45 }
 0x4e1   :  { %1751 = vmatmul.mubr.msk.bf16.vlgmr.msra.gmra.mrb[4].mxu1 %vm482_vm5, %v514_v44 }
 0x4e2   :  { %1766 = vmatprep.mubr.msk.bf16.mxu1 %vm2078_vm0, %v2077_v0  ;;  %1763 = vmatpush3.bf16.msra.mxu1 %v2385_v51 }
 0x4e3   :  { %1764 = vmatprep.subr.bf16.mxu1 %v2077_v0 }
 0x4e6   :  { %1765 = vmatpush3.bf16.msra.mxu1 %v2399_v8 }
 0x4e7   :  { %1778 = vmatprep.subr.bf16.mxu1 %v2077_v0 }
 0x5b4   :  { %v1752_v53 = vpop.f32.mrb[4].mxu1 }
 0x5b5   :  { %v582_v54 = vmul.f32 %v1752_v53, %v575_v52  ;;  %v559_v55 = vpop.f32.mrb[5].mxu1 }
 0x5b6   :  { %v580_v57 = vmul.f32 %v575_v52, %v559_v55  ;;  %v1753_v58 = vpop.f32.mrb[6].mxu1 }
 0x5b7   :  { %v583_v59 = vmul.f32 %v1753_v58, %v577_v56  ;;  %v562_v60 = vpop.f32.mrb[7].mxu1  ;;  %v587_v62 = vsel %vm296_vm3, %v582_v54, 0.0 }
 0x5b8   :  { %v581_v61 = vmul.f32 %v577_v56, %v562_v60  ;;  %v584_v1 = vsel %vm296_vm3, %v580_v57, 0.0  ;;  %v2441_v56 = vld [vmem:[%s2668_s14] ss:$0 sm:$0xff] }
 0x5b9   :  { %v588_v63 = vsel %vm296_vm3, %v583_v59, 0.0  ;;  %v2447_v60 = vld [vmem:[%s2669_s15] ss:$0 sm:$0xff] }
 0x5ba   :  { %v589_v4 = vadd.f32 %v588_v63, %v587_v62  ;;  %v585_v5 = vsel %vm296_vm3, %v581_v61, 0.0 }
 0x5bb   :  { %v586_v6 = vadd.f32 %v585_v5, %v584_v1  ;;  %v2482_v5 = vld [vmem:[%s2672_s18 + $0x18] sm:$0xff]  }
 0x5bd   :  { %v590_v7 = vpack.c.bf16 %v589_v4, %v586_v6  ;;  %v2462_v4 = vld [vmem:[%s2672_s18] sm:$0xff]  }
 0x5be   :  { %v2491_v6 = vld [vmem:[%s2671_s17] ss:$0 sm:$0xff] }
 0x5bf   :  { %1759 = vmatmul.mubr.msk.bf16.vlgmr.msra.gmra.mrb[8].mxu0 %vm296_vm3, %v590_v7 }
 0x5c0   :  { %1774 = vmatprep.mubr.msk.bf16.mxu0 %vm2078_vm0, %v2077_v0  ;;  %1771 = vmatpush3.bf16.msra.mxu0 %v2427_v40 }
 0x5c1   :  { %1772 = vmatprep.subr.bf16.mxu0 %v2077_v0 }
 0x5c4   :  { %1773 = vmatpush3.bf16.msra.mxu0 %v2434_v41 }
 0x5c5   :  { %1790 = vmatprep.subr.bf16.mxu0 %v2077_v0 }
 0x692   :  { %v640_v10 = vpop.f32.mrb[8].mxu0 }
 0x693   :  { %v1760_v11 = vpop.f32.mrb[9].mxu0  ;;  %v641_v13 = vadd.f32 %v2406_v9, %v640_v10 }
 0x694   :  { %v643_v12 = vpop.f32.mrb[10].mxu0 }
 0x695   :  { %v644_v14 = vadd.f32 %v2406_v9, %v643_v12  ;;  %v1761_v15 = vpop.f32.mrb[11].mxu0 }
 0x697   :  { %v647_v16 = vpack.c.bf16 %v644_v14, %v641_v13 }
 0x699   :  { %1767 = vmatmul.mubr.msk.bf16.vlgmr.msra.gmra.mrb[8].mxu1 %vm296_vm3, %v647_v16 }
 0x69a   :  { %1786 = vmatprep.mubr.msk.bf16.mxu1 %vm2078_vm0, %v2077_v0  ;;  %1779 = vmatpush3.bf16.msra.mxu1 %v2462_v4 }
 0x69b   :  { %1780 = vmatprep.subr.bf16.mxu1 %v2077_v0 }
 0x76c   :  { %v697_v18 = vpop.f32.mrb[8].mxu1 }
 0x76d   :  { %v698_v19 = vadd.f32 %v2416_v17, %v697_v18  ;;  %v1768_v20 = vpop.f32.mrb[9].mxu1 }
 0x76e   :  { %v700_v21 = vpop.f32.mrb[10].mxu1 }
 0x76f   :  { %v701_v22 = vadd.f32 %v2416_v17, %v700_v21  ;;  %v1769_v23 = vpop.f32.mrb[11].mxu1  ;;  %v704_v24 = vadd.f32 %v698_v19, %v641_v13 }
 0x771   :  { %v706_v25 = vsel %vm296_vm3, %v704_v24, 0.0  ;;  %v705_v26 = vadd.f32 %v701_v22, %v644_v14 }
 0x772   :  { %707 = vadd.xlane.f32.xlu0 %v706_v25 }
 0x773   :  { %v709_v27 = vsel %vm296_vm3, %v705_v26, 0.0 }
 0x774   :  { %710 = vadd.xlane.f32.xlu1 %v709_v27 }
 0x7ff   :  { %v708_v28 = vpop.xlane.xlu0 %707 }
 0x800   :  { %v712_v31 = vmul.f32 0.03125, %v708_v28 }
 0x801   :  { %v711_v32 = vpop.xlane.xlu1 %710 }
 0x802   :  { %v714_v33 = vsub.f32 %v704_v24, %v712_v31  ;;  %v713_v34 = vmul.f32 0.03125, %v711_v32 }
 0x804   :  { %v715_v35 = vsub.f32 %v705_v26, %v713_v34  ;;  %v716_v36 = vmul.f32 %v714_v33, %v714_v33 }
 0x806   :  { %v718_v37 = vsel %vm296_vm3, %v716_v36, 0.0  ;;  %v717_v38 = vmul.f32 %v715_v35, %v715_v35  ;;  %v2501_v36 = vld [vmem:[%s2673_s19] ss:$0 sm:$0xff] }
 0x807   :  { %719 = vadd.xlane.f32.xlu0 %v718_v37 }
 0x808   :  { %v721_v39 = vsel %vm296_vm3, %v717_v38, 0.0 }
 0x80b   :  { %722 = vadd.xlane.f32.xlu0 %v721_v39 }
 0x894   :  { %v720_v42 = vpop.xlane.xlu0 %719 }
 0x895   :  { %v724_v43 = vmul.f32 0.03125, %v720_v42 }
 0x897   :  { %v726_v44 = vadd.f32 1e-12, %v724_v43 }
 0x898   :  { %v723_v45 = vpop.xlane.xlu0 %722 }
 0x899   :  { %1911 = vrsqrt.f32 %v726_v44  ;;  %v725_v52 = vmul.f32 0.03125, %v723_v45 }
 0x89b   :  { %v727_v53 = vadd.f32 1e-12, %v725_v52 }
 0x89d   :  { %1913 = vrsqrt.f32 %v727_v53 }
 0x8a3   :  { %v1912_v54 = vpop.eup %1911 }
 0x8a4   :  { %v730_v55 = vmul.f32 %v1912_v54, %v714_v33 }
 0x8a6   :  { %v732_v58 = vmul.f32 %v2441_v56, %v730_v55 }
 0x8a7   :  { %v1914_v57 = vpop.eup %1913 }
 0x8a8   :  { %v731_v59 = vmul.f32 %v1914_v57, %v715_v35  ;;  %v734_v62 = vadd.f32 %v2447_v60, %v732_v58 }
 0x8aa   :  { %v733_v61 = vmul.f32 %v2441_v56, %v731_v59 }
 0x8ac   :  { %v735_v63 = vadd.f32 %v2447_v60, %v733_v61 }
 0x8ae   :  { %v736_v1 = vpack.c.bf16 %v735_v63, %v734_v62 }
 0x8b0   :  { %1775 = vmatmul.mubr.msk.bf16.vlgmr.msra.gmra.mrb[12].mxu0 %vm296_vm3, %v736_v1 }
 0x8b1   :  { %1791 = vmatpush3.bf16.msra.mxu0 %v2302_v29  ;;  %1794 = vmatprep.mubr.msk.bf16.mxu0 %vm2078_vm0, %v2077_v0  ;;  %v2468_v29 = vld [vmem:[%s2672_s18 + $0x8] sm:$0xff]  }
 0x8b2   :  { %1792 = vmatprep.subr.bf16.mxu0 %v2077_v0  ;;  %1781 = vmatpush3.bf16.msra.mxu1 %v2468_v29 }
 0x8b3   :  { %1782 = vmatprep.subr.bf16.mxu1 %v2077_v0 }
 0x8b5   :  { %1793 = vmatpush3.bf16.msra.mxu0 %v2308_v30  ;;  %v2475_v30 = vld [vmem:[%s2672_s18 + $0x10] sm:$0xff]  }
 0x8b6   :  { %1798 = vmatprep.subr.bf16.mxu0 %v2319_v48  ;;  %1783 = vmatpush3.bf16.msra.mxu1 %v2475_v30 }
 0x8b7   :  { %1784 = vmatprep.subr.bf16.mxu1 %v2077_v0 }
 0x8ba   :  { %1785 = vmatpush3.bf16.msra.mxu1 %v2482_v5 }
 0x8bb   :  { %1865 = vmatprep.subr.msk.bf16.mxu1 %vm521_vm4, %v2346_v2 }
 0x983   :  { %v786_v7 = vpop.f32.mrb[12].mxu0 }
 0x984   :  { %v787_v10 = vadd.f32 %v2491_v6, %v786_v7  ;;  %v1776_v11 = vpop.f32.mrb[13].mxu0 }
 0x985   :  { %v789_v12 = vpop.f32.mrb[14].mxu0 }
 0x986   :  { %v795_v13 = vmul.f32 0.044715, %v787_v10  ;;  %v790_v14 = vadd.f32 %v2491_v6, %v789_v12  ;;  %v1777_v15 = vpop.f32.mrb[15].mxu0  ;;  %v793_v28 = vmul.f32 0.5, %v787_v10 }
 0x988   :  { %v797_v16 = vmul.f32 %v795_v13, %v787_v10  ;;  %v796_v18 = vmul.f32 0.044715, %v790_v14  ;;  %v794_v31 = vmul.f32 0.5, %v790_v14 }
 0x98a   :  { %v799_v19 = vmul.f32 %v797_v16, %v787_v10  ;;  %v798_v20 = vmul.f32 %v796_v18, %v790_v14  ;;  %v2512_v18 = vld [vmem:[%s2674_s20] ss:$0 sm:$0xff] }
 0x98c   :  { %v801_v21 = vadd.f32 %v799_v19, %v787_v10  ;;  %v800_v2 = vmul.f32 %v798_v20, %v790_v14 }
 0x98e   :  { %v803_v22 = vmul.f32 0.7978846, %v801_v21  ;;  %v802_v23 = vadd.f32 %v800_v2, %v790_v14 }
 0x990   :  { %1915 = vtanh.f32 %v803_v22  ;;  %v804_v24 = vmul.f32 0.7978846, %v802_v23  ;;  %v2518_v22 = vld [vmem:[%s2675_s21] ss:$0 sm:$0xff] }
 0x992   :  { %1917 = vtanh.f32 %v804_v24 }
 0x99a   :  { %v1916_v25 = vpop.eup %1915 }
 0x99b   :  { %v807_v26 = vadd.f32 1.0, %v1916_v25 }
 0x99c   :  { %v1918_v27 = vpop.eup %1917 }
 0x99d   :  { %v808_v32 = vadd.f32 1.0, %v1918_v27  ;;  %v809_v33 = vmul.f32 %v807_v26, %v793_v28 }
 0x99f   :  { %v810_v34 = vmul.f32 %v808_v32, %v794_v31 }
 0x9a1   :  { %v811_v35 = vpack.c.bf16 %v810_v34, %v809_v33 }
 0x9a3   :  { %1787 = vmatmul.mubr.msk.bf16.vlgmr.msra.gmra.mrb[12].mxu1 %vm836_vm6, %v811_v35 }
 0x9a4   :  { %1807 = vmatpush3.bf16.msra.mxu1 %v2352_v3 }
 0x9a5   :  { %1820 = vmatprep.subr.bf16.mxu1 %v2077_v0 }
 0xa76   :  { %v874_v37 = vpop.f32.mrb[12].mxu1 }
 0xa77   :  { %v875_v38 = vadd.f32 %v2501_v36, %v874_v37  ;;  %v1788_v39 = vpop.f32.mrb[13].mxu1 }
 0xa78   :  { %v877_v42 = vpop.f32.mrb[14].mxu1 }
 0xa79   :  { %v878_v43 = vadd.f32 %v2501_v36, %v877_v42  ;;  %v1789_v44 = vpop.f32.mrb[15].mxu1  ;;  %v881_v45 = vadd.f32 %v875_v38, %v734_v62 }
 0xa7b   :  { %v883_v52 = vsel %vm296_vm3, %v881_v45, 0.0  ;;  %v882_v53 = vadd.f32 %v878_v43, %v735_v63 }
 0xa7c   :  { %884 = vadd.xlane.f32.xlu0 %v883_v52 }
 0xa7d   :  { %v886_v3 = vsel %vm296_vm3, %v882_v53, 0.0 }
 0xa7e   :  { %887 = vadd.xlane.f32.xlu1 %v886_v3 }
 0xb09   :  { %v885_v54 = vpop.xlane.xlu0 %884 }
 0xb0a   :  { %v889_v55 = vmul.f32 0.03125, %v885_v54 }
 0xb0b   :  { %v888_v57 = vpop.xlane.xlu1 %887 }
 0xb0c   :  { %v891_v58 = vsub.f32 %v881_v45, %v889_v55  ;;  %v890_v59 = vmul.f32 0.03125, %v888_v57 }
 0xb0e   :  { %v892_v61 = vsub.f32 %v882_v53, %v890_v59  ;;  %v893_v1 = vmul.f32 %v891_v58, %v891_v58 }
 0xb10   :  { %v895_v7 = vsel %vm296_vm3, %v893_v1, 0.0  ;;  %v894_v10 = vmul.f32 %v892_v61, %v892_v61 }
 0xb11   :  { %896 = vadd.xlane.f32.xlu0 %v895_v7 }
 0xb12   :  { %v898_v62 = vsel %vm296_vm3, %v894_v10, 0.0 }
 0xb13   :  { %899 = vadd.xlane.f32.xlu1 %v898_v62 }
 0xb9e   :  { %v897_v11 = vpop.xlane.xlu0 %896 }
 0xb9f   :  { %v901_v63 = vmul.f32 0.03125, %v897_v11 }
 0xba0   :  { %v900_v12 = vpop.xlane.xlu1 %899 }
 0xba1   :  { %v903_v13 = vadd.f32 1e-12, %v901_v63  ;;  %v902_v14 = vmul.f32 0.03125, %v900_v12 }
 0xba3   :  { %1919 = vrsqrt.f32 %v903_v13  ;;  %v904_v15 = vadd.f32 1e-12, %v902_v14 }
 0xba5   :  { %1921 = vrsqrt.f32 %v904_v15 }
 0xbad   :  { %v1920_v16 = vpop.eup %1919 }
 0xbae   :  { %v907_v19 = vmul.f32 %v1920_v16, %v891_v58 }
 0xbaf   :  { %v1922_v20 = vpop.eup %1921 }
 0xbb0   :  { %v909_v21 = vmul.f32 %v2512_v18, %v907_v19  ;;  %v908_v2 = vmul.f32 %v1922_v20, %v892_v61 }
 0xbb2   :  { %v910_v23 = vmul.f32 %v2512_v18, %v908_v2  ;;  %v911_v24 = vadd.f32 %v2518_v22, %v909_v21 }
 0xbb4   :  { %v912_v25 = vadd.f32 %v2518_v22, %v910_v23 }
 0xbb6   :  { %v913_v26 = vpack.c.bf16 %v912_v25, %v911_v24 }
 0xbb8   :  { %1795 = vmatmul.mubr.msk.bf16.vlgmr.msra.gmra.mrb[16].mxu0 %vm296_vm3, %v913_v26 }
 0xbb9   :  { %1799 = vmatpush3.bf16.msra.mxu0 %v2319_v48 }
 0xbba   :  { %1800 = vmatprep.subr.bf16.mxu0 %v2326_v49 }
 0xbbd   :  { %1801 = vmatpush3.bf16.msra.mxu0 %v2326_v49 }
 0xbbe   :  { %1812 = vmatprep.subr.bf16.mxu0 %v2077_v0 }
 0xc8b   :  { %v951_v27 = vpop.f32.mrb[16].mxu0 }
 0xc8c   :  { %v952_v28 = vadd.f32 %v2334_v50, %v951_v27  ;;  %v1796_v31 = vpop.f32.mrb[17].mxu0 }
 0xc8d   :  { %v954_v32 = vpop.f32.mrb[18].mxu0 }
 0xc8e   :  { %v955_v33 = vadd.f32 %v2334_v50, %v954_v32  ;;  %960 = vrot.lane.b32.xlu0 %v952_v28, %s2079_s0  ;;  %v1797_v34 = vpop.f32.mrb[19].mxu0 }
 0xc90   :  { %962 = vrot.lane.b32.xlu1 %v955_v33, %s2079_s0 }
 0xc94   :  { %1118 = vrot.lane.b32.xlu1 %v952_v28, %s2080_s2 }
 0xc98   :  { %1120 = vrot.lane.b32.xlu1 %v955_v33, %s2080_s2 }
 0xd00   :  { %v961_v48 = vpop.permute.xlu0 %960 }
 0xd01   :  { %v966_v35 = vmul.f32 %v961_v48, %v952_v28  ;;  %v968_v37 = vmul.f32 %v961_v48, %v955_v33 }
 0xd02   :  { %v963_v49 = vpop.permute.xlu1 %962 }
 0xd03   :  { %v967_v38 = vmul.f32 %v963_v49, %v952_v28  ;;  %v969_v39 = vmul.f32 %v963_v49, %v955_v33 }
 0xd05   :  { %v970_v42 = vpack.c.bf16 %v967_v38, %v966_v35  ;;  %v971_v43 = vpack.c.bf16 %v969_v39, %v968_v37 }
 0xd06   :  { %v1119_v49 = vpop.permute.xlu1 %1118 }
 0xd07   :  { %1802 = vmatprep.mubr.msk.bf16.mxu0 %vm296_vm3, %v970_v42 }
 0xd08   :  { %1803 = vmatmul.mubr.msk.bf16.vlgmr.msra.gmra.mrb[20].mxu0 %vm296_vm3, %v971_v43 }
 0xd09   :  { %1813 = vmatpush3.bf16.msra.mxu0 %v2371_v46  ;;  %1816 = vmatprep.mubr.msk.bf16.mxu0 %vm2078_vm0, %v2077_v0 }
 0xd0a   :  { %1814 = vmatprep.subr.bf16.mxu0 %v2077_v0  ;;  %v1121_v39 = vpop.permute.xlu1 %1120 }
 0xd0d   :  { %1815 = vmatpush3.bf16.msra.mxu0 %v2378_v47 }
 0xd0e   :  { %1828 = vmatprep.subr.bf16.mxu0 %v2077_v0 }
 0xddb   :  { %v1804_v50 = vpop.f32.mrb[20].mxu0 }
 0xddc   :  { %v1029_v44 = vmul.f32 0.35355338, %v1804_v50  ;;  %v1012_v45 = vpop.f32.mrb[21].mxu0 }
 0xddd   :  { %v1027_v52 = vmul.f32 0.35355338, %v1012_v45  ;;  %v1805_v53 = vpop.f32.mrb[22].mxu0 }
 0xdde   :  { %v1030_v3 = vmul.f32 0.35355338, %v1805_v53  ;;  %v1015_v54 = vpop.f32.mrb[23].mxu0  ;;  %v1034_v57 = vsel %vm482_vm5, %v1029_v44, -inf }
 0xddf   :  { %v1028_v55 = vmul.f32 0.35355338, %v1015_v54  ;;  %v1031_v58 = vsel %vm482_vm5, %v1027_v52, -inf }
 0xde0   :  { %v1035_v46 = vsel %vm482_vm5, %v1030_v3, -inf }
 0xde1   :  { %v1036_v59 = vmax.f32 %v1034_v57, %v1035_v46  ;;  %v1032_v61 = vsel %vm482_vm5, %v1028_v55, -inf }
 0xde2   :  { %v1033_v47 = vmax.f32 %v1031_v58, %v1032_v61 }
 0xde3   :  { %v1039_v1 = vsub.f32 %v1029_v44, %v1036_v59  ;;  %v1040_v7 = vsub.f32 %v1030_v3, %v1036_v59 }
 0xde4   :  { %v1037_v10 = vsub.f32 %v1027_v52, %v1033_v47  ;;  %v1038_v62 = vsub.f32 %v1028_v55, %v1033_v47 }
 0xde5   :  { %v1045_v11 = vmul.f32 1.442695, %v1039_v1  ;;  %v1047_v63 = vmul.f32 1.442695, %v1040_v7 }
 0xde6   :  { %v1041_v12 = vmul.f32 1.442695, %v1037_v10  ;;  %v1043_v13 = vmul.f32 1.442695, %v1038_v62 }
 0xde7   :  { %1923 = vpow2.f32 %v1045_v11 }
 0xde8   :  { %1925 = vpow2.f32 %v1047_v63 }
 0xde9   :  { %1927 = vpow2.f32 %v1041_v12 }
 0xdea   :  { %1929 = vpow2.f32 %v1043_v13 }
 0xdf1   :  { %v1924_v14 = vpop.eup %1923 }
 0xdf2   :  { %v1926_v15 = vpop.eup %1925  ;;  %v1052_v16 = vsel %vm482_vm5, %v1924_v14, 0.0 }
 0xdf3   :  { %v1928_v19 = vpop.eup %1927  ;;  %v1053_v20 = vsel %vm482_vm5, %v1926_v15, 0.0 }
 0xdf4   :  { %v1930_v21 = vpop.eup %1929  ;;  %v1054_v2 = vadd.f32 %v1053_v20, %v1052_v16  ;;  %v1049_v23 = vsel %vm482_vm5, %v1928_v19, 0.0 }
 0xdf5   :  { %v1050_v24 = vsel %vm482_vm5, %v1930_v21, 0.0 }
 0xdf6   :  { %1931 = vrcp.f32 %v1054_v2  ;;  %v1051_v25 = vadd.f32 %v1050_v24, %v1049_v23 }
 0xdf8   :  { %1933 = vrcp.f32 %v1051_v25 }
 0xe00   :  { %v1932_v26 = vpop.eup %1931 }
 0xe01   :  { %v1059_v27 = vmul.f32 %v1932_v26, %v1924_v14  ;;  %v1060_v28 = vmul.f32 %v1932_v26, %v1926_v15 }
 0xe02   :  { %v1934_v31 = vpop.eup %1933 }
 0xe03   :  { %v1057_v32 = vmul.f32 %v1934_v31, %v1928_v19  ;;  %v1058_v33 = vmul.f32 %v1934_v31, %v1930_v21  ;;  %v1062_v34 = vpack.c.bf16 %v1060_v28, %v1059_v27 }
 0xe05   :  { %v1061_v48 = vpack.c.bf16 %v1058_v33, %v1057_v32 }
 0xe07   :  { %1808 = vmatprep.mubr.msk.bf16.mxu1 %vm482_vm5, %v1061_v48 }
 0xe08   :  { %1809 = vmatmul.mubr.msk.bf16.vlgmr.msra.gmra.mrb[16].mxu1 %vm482_vm5, %v1062_v34 }
 0xe09   :  { %1821 = vmatpush3.bf16.msra.mxu1 %v2385_v51  ;;  %1824 = vmatprep.mubr.msk.bf16.mxu1 %vm2078_vm0, %v2077_v0 }
 0xe0a   :  { %1822 = vmatprep.subr.bf16.mxu1 %v2077_v0 }
 0xe0d   :  { %1823 = vmatpush3.bf16.msra.mxu1 %v2399_v8 }
 0xe0e   :  { %1836 = vmatprep.subr.bf16.mxu1 %v2077_v0 }
 0xedb   :  { %v1810_v35 = vpop.f32.mrb[16].mxu1 }
 0xedc   :  { %v1126_v37 = vmul.f32 %v1810_v35, %v1119_v49  ;;  %v1103_v38 = vpop.f32.mrb[17].mxu1 }
 0xedd   :  { %v1124_v42 = vmul.f32 %v1119_v49, %v1103_v38  ;;  %v1811_v43 = vpop.f32.mrb[18].mxu1 }
 0xede   :  { %v1127_v50 = vmul.f32 %v1811_v43, %v1121_v39  ;;  %v1106_v44 = vpop.f32.mrb[19].mxu1  ;;  %v1131_v51 = vsel %vm296_vm3, %v1126_v37, 0.0 }
 0xedf   :  { %v1125_v45 = vmul.f32 %v1121_v39, %v1106_v44  ;;  %v1128_v53 = vsel %vm296_vm3, %v1124_v42, 0.0 }
 0xee0   :  { %v1132_v52 = vsel %vm296_vm3, %v1127_v50, 0.0 }
 0xee1   :  { %v1133_v3 = vadd.f32 %v1132_v52, %v1131_v51  ;;  %v1129_v8 = vsel %vm296_vm3, %v1125_v45, 0.0 }
 0xee2   :  { %v1130_v54 = vadd.f32 %v1129_v8, %v1128_v53 }
 0xee4   :  { %v1134_v55 = vpack.c.bf16 %v1133_v3, %v1130_v54 }
 0xee6   :  { %1817 = vmatmul.mubr.msk.bf16.vlgmr.msra.gmra.mrb[24].mxu0 %vm296_vm3, %v1134_v55 }
 0xee7   :  { %1829 = vmatpush3.bf16.msra.mxu0 %v2427_v40  ;;  %1832 = vmatprep.mubr.msk.bf16.mxu0 %vm2078_vm0, %v2077_v0 }
 0xee8   :  { %1830 = vmatprep.subr.bf16.mxu0 %v2077_v0 }
 0xeeb   :  { %1831 = vmatpush3.bf16.msra.mxu0 %v2434_v41 }
 0xeec   :  { %1848 = vmatprep.subr.bf16.mxu0 %v2077_v0 }
 0xfb9   :  { %v1172_v57 = vpop.f32.mrb[24].mxu0 }
 0xfba   :  { %v1818_v46 = vpop.f32.mrb[25].mxu0  ;;  %v1173_v59 = vadd.f32 %v2406_v9, %v1172_v57 }
 0xfbb   :  { %v1175_v58 = vpop.f32.mrb[26].mxu0 }
 0xfbc   :  { %v1176_v61 = vadd.f32 %v2406_v9, %v1175_v58  ;;  %v1819_v47 = vpop.f32.mrb[27].mxu0 }
 0xfbe   :  { %v1179_v1 = vpack.c.bf16 %v1176_v61, %v1173_v59 }
 0xfc0   :  { %1825 = vmatmul.mubr.msk.bf16.vlgmr.msra.gmra.mrb[20].mxu1 %vm296_vm3, %v1179_v1 }
 0xfc1   :  { %1837 = vmatpush3.bf16.msra.mxu1 %v2462_v4  ;;  %1844 = vmatprep.mubr.msk.bf16.mxu1 %vm2078_vm0, %v2077_v0 }
 0xfc2   :  { %1838 = vmatprep.subr.bf16.mxu1 %v2077_v0 }
 0xfc5   :  { %1839 = vmatpush3.bf16.msra.mxu1 %v2468_v29 }
 0xfc6   :  { %1840 = vmatprep.subr.bf16.mxu1 %v2077_v0 }
 0xfc9   :  { %1841 = vmatpush3.bf16.msra.mxu1 %v2475_v30 }
 0xfca   :  { %1842 = vmatprep.subr.bf16.mxu1 %v2077_v0 }
 0xfcd   :  { %1843 = vmatpush3.bf16.msra.mxu1 %v2482_v5 }
0x1093   :  { %v1217_v9 = vpop.f32.mrb[20].mxu1 }
0x1094   :  { %v1218_v40 = vadd.f32 %v2416_v17, %v1217_v9  ;;  %v1826_v41 = vpop.f32.mrb[21].mxu1 }
0x1095   :  { %v1220_v4 = vpop.f32.mrb[22].mxu1 }
0x1096   :  { %v1221_v7 = vadd.f32 %v2416_v17, %v1220_v4  ;;  %v1827_v10 = vpop.f32.mrb[23].mxu1  ;;  %v1224_v62 = vadd.f32 %v1218_v40, %v1173_v59 }
0x1098   :  { %v1226_v11 = vsel %vm296_vm3, %v1224_v62, 0.0  ;;  %v1225_v29 = vadd.f32 %v1221_v7, %v1176_v61 }
0x1099   :  { %1227 = vadd.xlane.f32.xlu0 %v1226_v11 }
0x109a   :  { %v1229_v63 = vsel %vm296_vm3, %v1225_v29, 0.0 }
0x109b   :  { %1230 = vadd.xlane.f32.xlu1 %v1229_v63 }
0x1126   :  { %v1228_v30 = vpop.xlane.xlu0 %1227 }
0x1127   :  { %v1232_v12 = vmul.f32 0.03125, %v1228_v30 }
0x1128   :  { %v1231_v13 = vpop.xlane.xlu1 %1230 }
0x1129   :  { %v1234_v5 = vsub.f32 %v1224_v62, %v1232_v12  ;;  %v1233_v14 = vmul.f32 0.03125, %v1231_v13 }
0x112b   :  { %v1235_v15 = vsub.f32 %v1225_v29, %v1233_v14  ;;  %v1236_v16 = vmul.f32 %v1234_v5, %v1234_v5 }
0x112d   :  { %v1238_v19 = vsel %vm296_vm3, %v1236_v16, 0.0  ;;  %v1237_v20 = vmul.f32 %v1235_v15, %v1235_v15 }
0x112e   :  { %1239 = vadd.xlane.f32.xlu0 %v1238_v19 }
0x112f   :  { %v1241_v17 = vsel %vm296_vm3, %v1237_v20, 0.0 }
0x1132   :  { %1242 = vadd.xlane.f32.xlu0 %v1241_v17  ;;  %v1891_v17 = vld [vmem:[%s2676_s22] sm:$0xff]  }
0x11bb   :  { %v1240_v21 = vpop.xlane.xlu0 %1239 }
0x11bc   :  { %v1244_v2 = vmul.f32 0.03125, %v1240_v21  ;;  %v1892_v21 = vld [vmem:[%s2676_s22 + $0x8] sm:$0xff]  }
0x11be   :  { %v1246_v23 = vadd.f32 1e-12, %v1244_v2 }
0x11bf   :  { %v1243_v24 = vpop.xlane.xlu0 %1242 }
0x11c0   :  { %1935 = vrsqrt.f32 %v1246_v23  ;;  %v1245_v25 = vmul.f32 0.03125, %v1243_v24 }
0x11c2   :  { %v1247_v26 = vadd.f32 1e-12, %v1245_v25 }
0x11c4   :  { %1937 = vrsqrt.f32 %v1247_v26 }
0x11ca   :  { %v1936_v27 = vpop.eup %1935 }
0x11cb   :  { %v1250_v28 = vmul.f32 %v1936_v27, %v1234_v5 }
0x11cd   :  { %v1252_v32 = vmul.f32 %v2441_v56, %v1250_v28 }
0x11ce   :  { %v1938_v31 = vpop.eup %1937 }
0x11cf   :  { %v1251_v33 = vmul.f32 %v1938_v31, %v1235_v15  ;;  %v1254_v48 = vadd.f32 %v2447_v60, %v1252_v32 }
0x11d1   :  { %v1253_v34 = vmul.f32 %v2441_v56, %v1251_v33 }
0x11d3   :  { %v1255_v49 = vadd.f32 %v2447_v60, %v1253_v34 }
0x11d5   :  { %v1256_v35 = vpack.c.bf16 %v1255_v49, %v1254_v48 }
0x11d7   :  { %1833 = vmatmul.mubr.msk.bf16.vlgmr.msra.gmra.mrb[28].mxu0 %vm296_vm3, %v1256_v35 }
0x11d8   :  { %1852 = vmatprep.mubr.msk.bf16.mxu0 %vm2078_vm0, %v2077_v0  ;;  %1849 = vmatpush3.bf16.msra.mxu0 %v1891_v17  ;;  %v1664_v17 = vld [vmem:[%s2678_s24] ss:$0 sm:$0xff]  ;;  %s1601_s24 = sshll.u32 %s2081_s4, 4  ;;  %s1602_s24 = int_to_ptr.vmem [resolvable:$true] %s1601_s24 }
0x11d9   :  { %1850 = vmatprep.subr.bf16.mxu0 %v2077_v0  ;;  %p2048_p5 = scmp.lt.s32.totalorder %s1602_s24, %s1602_s24 }
0x11dc   :  { %1851 = vmatpush3.bf16.msra.mxu0 %v1892_v21 }
0x11dd   :  { %1856 = vmatprep.subr.bf16.mxu0 %v2077_v0 }
0x12aa   :  { %v1294_v37 = vpop.f32.mrb[28].mxu0 }
0x12ab   :  { %v1295_v38 = vadd.f32 %v2491_v6, %v1294_v37  ;;  %v1834_v39 = vpop.f32.mrb[29].mxu0 }
0x12ac   :  { %v1297_v42 = vpop.f32.mrb[30].mxu0 }
0x12ad   :  { %v1303_v43 = vmul.f32 0.044715, %v1295_v38  ;;  %v1298_v50 = vadd.f32 %v2491_v6, %v1297_v42  ;;  %v1835_v44 = vpop.f32.mrb[31].mxu0  ;;  %v1301_v58 = vmul.f32 0.5, %v1295_v38 }
0x12af   :  { %v1305_v56 = vmul.f32 %v1303_v43, %v1295_v38  ;;  %v1304_v45 = vmul.f32 0.044715, %v1298_v50  ;;  %v1302_v59 = vmul.f32 0.5, %v1298_v50 }
0x12b1   :  { %v1307_v51 = vmul.f32 %v1305_v56, %v1295_v38  ;;  %v1306_v52 = vmul.f32 %v1304_v45, %v1298_v50 }
0x12b3   :  { %v1309_v60 = vadd.f32 %v1307_v51, %v1295_v38  ;;  %v1308_v53 = vmul.f32 %v1306_v52, %v1298_v50  ;;  %v1660_v38 = vld [vmem:[%s2677_s23] ss:$0 sm:$0xff] }
0x12b5   :  { %v1311_v3 = vmul.f32 0.7978846, %v1309_v60  ;;  %v1310_v8 = vadd.f32 %v1308_v53, %v1298_v50 }
0x12b7   :  { %1939 = vtanh.f32 %v1311_v3  ;;  %v1312_v54 = vmul.f32 0.7978846, %v1310_v8 }
0x12b9   :  { %1941 = vtanh.f32 %v1312_v54 }
0x12c1   :  { %v1940_v55 = vpop.eup %1939 }
0x12c2   :  { %v1315_v57 = vadd.f32 1.0, %v1940_v55 }
0x12c3   :  { %v1942_v46 = vpop.eup %1941 }
0x12c4   :  { %v1316_v61 = vadd.f32 1.0, %v1942_v46  ;;  %v1317_v47 = vmul.f32 %v1315_v57, %v1301_v58 }
0x12c6   :  { %v1318_v6 = vmul.f32 %v1316_v61, %v1302_v59 }
0x12c8   :  { %v1319_v1 = vpack.c.bf16 %v1318_v6, %v1317_v47 }
0x12ca   :  { %1845 = vmatmul.mubr.msk.bf16.vlgmr.msra.gmra.mrb[24].mxu1 %vm836_vm6, %v1319_v1 }
0x139d   :  { %v1357_v9 = vpop.f32.mrb[24].mxu1 }
0x139e   :  { %v1358_v40 = vadd.f32 %v2501_v36, %v1357_v9  ;;  %v1846_v41 = vpop.f32.mrb[25].mxu1 }
0x139f   :  { %v1360_v4 = vpop.f32.mrb[26].mxu1 }
0x13a0   :  { %v1361_v7 = vadd.f32 %v2501_v36, %v1360_v4  ;;  %v1847_v10 = vpop.f32.mrb[27].mxu1  ;;  %v1364_v62 = vadd.f32 %v1358_v40, %v1254_v48 }
0x13a2   :  { %v1366_v11 = vsel %vm296_vm3, %v1364_v62, 0.0  ;;  %v1365_v29 = vadd.f32 %v1361_v7, %v1255_v49 }
0x13a3   :  { %1367 = vadd.xlane.f32.xlu0 %v1366_v11 }
0x13a4   :  { %v1369_v63 = vsel %vm296_vm3, %v1365_v29, 0.0 }
0x13a5   :  { %1370 = vadd.xlane.f32.xlu1 %v1369_v63 }
0x1430   :  { %v1368_v30 = vpop.xlane.xlu0 %1367 }
0x1431   :  { %v1372_v12 = vmul.f32 0.03125, %v1368_v30 }
0x1432   :  { %v1371_v13 = vpop.xlane.xlu1 %1370 }
0x1433   :  { %v1374_v5 = vsub.f32 %v1364_v62, %v1372_v12  ;;  %v1373_v14 = vmul.f32 0.03125, %v1371_v13  ;;  %v1893_v12 = vld [vmem:[%s2680_s26] sm:$0xff]   ;;  %v1894_v13 = vld [vmem:[%s2680_s26 + $0x8] sm:$0xff]  }
0x1435   :  { %v1375_v15 = vsub.f32 %v1365_v29, %v1373_v14  ;;  %v1376_v16 = vmul.f32 %v1374_v5, %v1374_v5 }
0x1437   :  { %v1378_v19 = vsel %vm296_vm3, %v1376_v16, 0.0  ;;  %v1377_v20 = vmul.f32 %v1375_v15, %v1375_v15 }
0x1438   :  { %1379 = vadd.xlane.f32.xlu0 %v1378_v19 }
0x1439   :  { %v1381_v36 = vsel %vm296_vm3, %v1377_v20, 0.0 }
0x143a   :  { %1382 = vadd.xlane.f32.xlu1 %v1381_v36 }
0x14c5   :  { %v1380_v2 = vpop.xlane.xlu0 %1379 }
0x14c6   :  { %v1384_v23 = vmul.f32 0.03125, %v1380_v2 }
0x14c7   :  { %v1383_v24 = vpop.xlane.xlu1 %1382 }
0x14c8   :  { %v1386_v25 = vadd.f32 1e-12, %v1384_v23  ;;  %v1385_v26 = vmul.f32 0.03125, %v1383_v24  ;;  %v1665_v24 = vld [vmem:[%s2679_s25] ss:$0 sm:$0xff]  ;;  %s2043_s25 = scalar_lea.vmem %s1602_s24, 256 }
0x14c9   :  { %p2044_p4 = scmp.ne.s32.totalorder %s1602_s24, %s2043_s25  ;;  %p2049_p6 = scmp.lt.s32.totalorder %s2043_s25, %s2043_s25 }
0x14ca   :  { %1943 = vrsqrt.f32 %v1386_v25  ;;  %v1387_v27 = vadd.f32 1e-12, %v1385_v26 }
0x14cb   :  { %p2050_p7 = por %p2049_p6, %p2048_p5 }
0x14cc   :  { %1945 = vrsqrt.f32 %v1387_v27 }
0x14cd   :  { %p2051_p8 = pnand %p2050_p7, %p2044_p4 }
0x14d4   :  { %v1944_v28 = vpop.eup %1943 }
0x14d5   :  { %v1390_v31 = vmul.f32 %v1944_v28, %v1374_v5 }
0x14d6   :  { %v1946_v32 = vpop.eup %1945 }
0x14d7   :  { %v1392_v33 = vmul.f32 %v2512_v18, %v1390_v31  ;;  %v1391_v34 = vmul.f32 %v1946_v32, %v1375_v15  ;;  %v1666_v31 = vld [vmem:[%s2681_s27] ss:$0 sm:$0xff] }
0x14d9   :  { %v1393_v48 = vmul.f32 %v2512_v18, %v1391_v34  ;;  %v1394_v49 = vadd.f32 %v2518_v22, %v1392_v33 }
0x14db   :  { %v1395_v35 = vadd.f32 %v2518_v22, %v1393_v48 }
0x14dd   :  { %v1396_v37 = vpack.c.bf16 %v1395_v35, %v1394_v49 }
0x14df   :  { %1853 = vmatmul.mubr.msk.bf16.vlgmr.msra.gmra.mrb[32].mxu0 %vm296_vm3, %v1396_v37 }
0x14e0   :  { %1860 = vmatprep.mubr.msk.bf16.mxu0 %vm2078_vm0, %v2077_v0  ;;  %1857 = vmatpush3.bf16.msra.mxu0 %v1893_v12 }
0x14e1   :  { %1858 = vmatprep.subr.bf16.mxu0 %v2077_v0 }
0x14e4   :  { %1859 = vmatpush3.bf16.msra.mxu0 %v1894_v13 }
0x15b2   :  { %v1457_v39 = vpop.f32.mrb[32].mxu0 }
0x15b3   :  { %v1458_v42 = vadd.f32 %v1660_v38, %v1457_v39  ;;  %v1854_v43 = vpop.f32.mrb[33].mxu0 }
0x15b4   :  { %v1460_v50 = vpop.f32.mrb[34].mxu0 }
0x15b5   :  { %v1466_v44 = vmul.f32 0.044715, %v1458_v42  ;;  %v1461_v18 = vadd.f32 %v1660_v38, %v1460_v50  ;;  %v1855_v56 = vpop.f32.mrb[35].mxu0  ;;  %v1464_v57 = vmul.f32 0.5, %v1458_v42 }
0x15b7   :  { %v1467_v45 = vmul.f32 0.044715, %v1461_v18  ;;  %v1468_v51 = vmul.f32 %v1466_v44, %v1458_v42  ;;  %v1465_v61 = vmul.f32 0.5, %v1461_v18 }
0x15b9   :  { %v1470_v22 = vmul.f32 %v1468_v51, %v1458_v42  ;;  %v1469_v52 = vmul.f32 %v1467_v45, %v1461_v18 }
0x15bb   :  { %v1472_v60 = vadd.f32 %v1470_v22, %v1458_v42  ;;  %v1471_v53 = vmul.f32 %v1469_v52, %v1461_v18 }
0x15bd   :  { %v1474_v3 = vmul.f32 0.7978846, %v1472_v60  ;;  %v1473_v8 = vadd.f32 %v1471_v53, %v1461_v18 }
0x15bf   :  { %1947 = vtanh.f32 %v1474_v3  ;;  %v1475_v54 = vmul.f32 0.7978846, %v1473_v8 }
0x15c1   :  { %1949 = vtanh.f32 %v1475_v54 }
0x15c9   :  { %v1948_v55 = vpop.eup %1947 }
0x15ca   :  { %v1478_v46 = vadd.f32 1.0, %v1948_v55 }
0x15cb   :  { %v1950_v58 = vpop.eup %1949 }
0x15cc   :  { %v1480_v59 = vmul.f32 %v1478_v46, %v1464_v57  ;;  %v1479_v47 = vadd.f32 1.0, %v1950_v58 }
0x15ce   :  { %v1484_v6 = vsel %vm296_vm3, %v1480_v59, 0.0  ;;  %v1481_v1 = vmul.f32 %v1479_v47, %v1465_v61 }
0x15cf   :  { %1485 = vadd.xlane.f32.xlu0 %v1484_v6 }
0x15d0   :  { %v1487_v9 = vsel %vm296_vm3, %v1481_v1, 0.0 }
0x15d1   :  { %1488 = vadd.xlane.f32.xlu1 %v1487_v9 }
0x165c   :  { %v1486_v40 = vpop.xlane.xlu0 %1485 }
0x165d   :  { %v1490_v41 = vmul.f32 0.03125, %v1486_v40 }
0x165e   :  { %v1489_v4 = vpop.xlane.xlu1 %1488 }
0x165f   :  { %v1492_v7 = vsub.f32 %v1480_v59, %v1490_v41  ;;  %v1491_v10 = vmul.f32 0.03125, %v1489_v4 }
0x1661   :  { %v1493_v62 = vsub.f32 %v1481_v1, %v1491_v10  ;;  %v1494_v11 = vmul.f32 %v1492_v7, %v1492_v7 }
0x1663   :  { %v1496_v29 = vsel %vm296_vm3, %v1494_v11, 0.0  ;;  %v1495_v63 = vmul.f32 %v1493_v62, %v1493_v62 }
0x1664   :  { %1497 = vadd.xlane.f32.xlu0 %v1496_v29 }
0x1665   :  { %v1499_v30 = vsel %vm296_vm3, %v1495_v63, 0.0 }
0x1666   :  { %1500 = vadd.xlane.f32.xlu1 %v1499_v30 }
0x16f1   :  { %v1498_v5 = vpop.xlane.xlu0 %1497 }
0x16f2   :  { %v1502_v14 = vmul.f32 0.03125, %v1498_v5 }
0x16f3   :  { %v1501_v15 = vpop.xlane.xlu1 %1500 }
0x16f4   :  { %v1504_v16 = vadd.f32 1e-12, %v1502_v14  ;;  %v1503_v19 = vmul.f32 0.03125, %v1501_v15 }
0x16f6   :  { %1951 = vrsqrt.f32 %v1504_v16  ;;  %v1505_v20 = vadd.f32 1e-12, %v1503_v19 }
0x16f8   :  { %1953 = vrsqrt.f32 %v1505_v20 }
0x1700   :  { %v1952_v36 = vpop.eup %1951 }
0x1701   :  { %v1508_v21 = vmul.f32 %v1952_v36, %v1492_v7 }
0x1702   :  { %v1954_v0 = vpop.eup %1953 }
0x1703   :  { %v1516_v2 = vmul.f32 %v1664_v17, %v1508_v21  ;;  %v1509_v23 = vmul.f32 %v1954_v0, %v1493_v62 }
0x1705   :  { %v1517_v25 = vmul.f32 %v1664_v17, %v1509_v23  ;;  %v1524_v26 = vadd.f32 %v1665_v24, %v1516_v2 }
0x1707   :  { %v1525_v27 = vadd.f32 %v1665_v24, %v1517_v25 }
0x1709   :  { %v1526_v28 = vpack.c.bf16 %v1525_v27, %v1524_v26 }
0x170b   :  { %1861 = vmatmul.mubr.msk.bf16.vlgmr.msra.gmra.mrb[36].mxu0 %vm296_vm3, %v1526_v28 }
0x17de   :  { %v1587_v32 = vpop.f32.mrb[36].mxu0 }
0x17df   :  { %v1588_v33 = vadd.f32 %v1666_v31, %v1587_v32  ;;  %v1862_v34 = vpop.f32.mrb[37].mxu0 }
0x17e0   :  { %v1590_v48 = vpop.f32.mrb[38].mxu0 }
0x17e1   :  { %1594 = vst [vmem:[#allocation10] sm:$0xff] %v1588_v33  ;;  %v1591_v49 = vadd.f32 %v1666_v31, %v1590_v48  ;;  %v1863_v35 = vpop.f32.mrb[39].mxu0 }
0x17e3   :  { %1595 = vst [vmem:[#allocation10 + $0x8] sm:$0xff] %v1591_v49 }
0x17e4   :  { %2054 = shalt.err (!%p2051_p8)
}
0x17e5   :  { %s2721_s6 = sld [smem:[#allocation28_spill]] }
0x17eb   :  { %s2055_s28 = scalar_lea.hbm %s2721_s6, 256 }
0x17ec   :  { %p2056_p9 = scmp.ne.s32.totalorder %s2721_s6, %s2055_s28  ;;  %p2059_p10 = scmp.lt.u32.totalorder %s2055_s28, %s2721_s6 }
0x17ee   :  { %p2061_p11 = pnand %p2059_p10, %p2056_p9 }
0x17f0   :  { %2064 = shalt.err (!%p2061_p11)
}
0x17f1   :  { %s2082_s19 = smov 128   ;;  %s2083_s13 = smov 8  }
0x17f2   :  { %1607 = dma.vmem_to_hbm [thread:$0]  %s1602_s24, 256, %s2721_s6, [#allocation4], %s2082_s19, %s2082_s19, %s2083_s13  }
0x17f3   :  { %2071 = dma.done.wait [#allocation4], 256  }
0x17f4   :  { %2072 = vsyncadd [#allocation4], 4294967040 }
0x17f5   :  { %1611 = vsyncpa [#allocation3], 1 }
0x17f6   :  { %1612 = vsyncpa [#allocation6], 1 }
0x17f7   :  { %1613 = vsyncpa [#allocation9], 1 }
0x17f8   :  { %1614 = vsyncpa [#allocation4], 1 }

</bundles_post_ra>
